<compile_context>
chip_gen: v7x
topology: tpu7x:2x2x1
jax: 0.10.0
libtpu: 0.0.40
codegen_flags: <defaults>
</compile_context>

<pallas_src>
import math
import functools

import jax
import jax.numpy as jnp
from jax.experimental import pallas as pl
from jax.experimental.pallas import tpu as pltpu


# ------------------------------ math helpers --------------------------------
def _layernorm(x, g, b, eps=1e-5):
    mu = jnp.mean(x, axis=-1, keepdims=True)
    var = jnp.mean((x - mu) ** 2, axis=-1, keepdims=True)
    return (x - mu) * jax.lax.rsqrt(var + eps) * g + b


def _gelu_tanh(x):
    c = math.sqrt(2.0 / math.pi)
    return 0.5 * x * (1.0 + jnp.tanh(c * (x + 0.044715 * x * x * x)))


# --------------------------- sizing / tiling ---------------------------------
def _vmem_capacity_bytes():
    try:
        return int(pltpu.get_tpu_info().vmem_capacity_bytes)
    except Exception:
        return 64 << 20          # conservative (v7x-sized) fallback


def _pad_lane(n, lane=128):
    return ((n + lane - 1) // lane) * lane


def _pick_seq_tile(T, vmem_cap):
    if T <= 256:
        return T
    prefs = (512, 256, 128) if vmem_cap >= (96 << 20) else (256, 128, 512)
    for c in prefs:
        if T % c == 0:
            return c
    return T


def _pick_k_chunk(T, vmem_cap):
    if T <= 512:
        return T
    prefs = (512, 256, 128) if vmem_cap >= (96 << 20) else (256, 128, 512)
    for c in prefs:
        if T % c == 0:
            return c
    return T


def _pick_kv_tile(T):
    if T <= 512:
        return T
    for c in (512, 256, 128):
        if T % c == 0:
            return c
    return T


def _pick_mlp_chunk(H4, vmem_cap):
    if H4 <= 1024:
        return H4
    prefs = ((1024, 512, 768, 896, 640, 384, 256, 128)
             if vmem_cap >= (96 << 20) else
             (512, 1024, 768, 384, 256, 128))
    for c in prefs:
        if H4 % c == 0:
            return c
    return H4


def _kv_vmem_bytes(T, C, tkv, n_head, vmem_cap):
    f32, bf16 = 4, 2
    hd_p = _pad_lane(C // n_head)
    wkv = 2 * C * C * bf16                         # single-buffered bf16 Wkv
    small = 8 * C * f32                            # LN params + bias
    x_blk = 2 * tkv * C * f32                      # double-buffered x tile
    kv_tmp = tkv * 2 * C * (f32 + bf16)            # projection intermediate
    out_blk = 2 * 2 * n_head * tkv * hd_p * bf16   # K/V out blocks (double-buffered)
    total = wkv + small + x_blk + kv_tmp + out_blk + (8 << 20)
    return int(min(max(total, 16 << 20), int(0.85 * vmem_cap)))


def _main_vmem_bytes(T, C, tq, kc, n_head, mlp_chunk, vmem_cap):
    f32, bf16 = 4, 2
    hd_p = _pad_lane(C // n_head)
    H4 = 4 * C
    weights = (2 * C * C + 2 * C * H4) * bf16             # Wq, Wap, Wfc, Wmp (single-buffered)
    small = (8 * C + 2 * H4) * f32                        # LN params + biases
    kv_in = 2 * n_head * T * hd_p * bf16                  # K + V (single-buffered, lane-padded)
    x_blk = 2 * tq * C * f32
    o_blk = 2 * tq * C * f32
    q_sc = n_head * tq * hd_p * bf16
    y_sc = tq * C * f32
    scores = n_head * tq * kc * (2 * f32 + bf16)          # s, p (f32) + p (bf16)
    o3 = 2 * n_head * tq * hd_p * f32                     # acc + normalized copy
    mlp = tq * mlp_chunk * (2 * f32 + bf16)
    total = (weights + small + kv_in + x_blk + o_blk + q_sc + y_sc
             + scores + o3 + mlp + (8 << 20))
    return int(min(max(total, 16 << 20), int(0.85 * vmem_cap)))


# ------------------------------- kernels -------------------------------------
def _kv_proj_kernel(x_ref, ln1_g_ref, ln1_b_ref, wkv_ref, bkv_ref,
                    k_ref, v_ref, *, n_head):
    # x_ref: (tkv, C); k_ref / v_ref: (n_head, tkv, hd) bf16 (head-major).
    C = x_ref.shape[1]
    hd = C // n_head
    xf = x_ref[...].astype(jnp.float32)
    h = _layernorm(xf, ln1_g_ref[...], ln1_b_ref[...]).astype(jnp.bfloat16)
    kv = jnp.dot(h, wkv_ref[...], preferred_element_type=jnp.float32) + bkv_ref[...]
    kvb = kv.astype(jnp.bfloat16)                         # (tkv, 2C)
    for hh in range(n_head):
        k_ref[hh] = kvb[:, hh * hd:(hh + 1) * hd]
        v_ref[hh] = kvb[:, C + hh * hd:C + (hh + 1) * hd]


def encoder_block_kernel(
    x_ref,                                   # (tq, C)
    ln1_g_ref, ln1_b_ref,
    wq_ref, bq_ref,                          # (C, C) bf16, (1, C) f32  (scale folded in)
    k_ref, v_ref,                            # (n_head, T, hd) bf16 — whole sequence, this batch
    wap_ref, bap_ref,                        # (C, C) bf16, (1, C) f32
    ln2_g_ref, ln2_b_ref,
    wfc_ref, bfc_ref,                        # (C, 4C) bf16, (1, 4C) f32
    wmp_ref, bmp_ref,                        # (4C, C) bf16, (1, C) f32
    o_ref,                                   # (tq, C)
    q_sc,                                    # (n_head, tq, hd) bf16 scratch
    y_sc,                                    # (tq, C) f32 scratch (merged heads)
    *, n_head, k_chunk, mlp_chunk,
):
    tq, C = x_ref.shape
    T = k_ref.shape[1]
    hd = C // n_head

    # ---- Q projection for this q-tile (1/sqrt(hd) already folded into Wq/bq) ----
    x_t = x_ref[...].astype(jnp.float32)
    h1 = _layernorm(x_t, ln1_g_ref[...], ln1_b_ref[...]).astype(jnp.bfloat16)
    q = jnp.dot(h1, wq_ref[...], preferred_element_type=jnp.float32) + bq_ref[...]
    qb = q.astype(jnp.bfloat16)
    for h in range(n_head):                                   # head-major staging
        q_sc[h] = qb[:, h * hd:(h + 1) * hd]
    q_hm = q_sc[...]                                          # (H, tq, hd) bf16

    # ---- online-softmax attention over K/V chunks (no (H, tq, T) residency) ----
    nk = T // k_chunk
    m = l = acc = None
    for j in range(nk):
        lo = j * k_chunk
        hi = lo + k_chunk
        k_j = k_ref[:, lo:hi, :]                              # (H, kc, hd) bf16
        v_j = v_ref[:, lo:hi, :]
        s = jnp.einsum("hqd,hkd->hqk", q_hm, k_j,
                       preferred_element_type=jnp.float32)    # (H, tq, kc) f32
        s_max = jnp.max(s, axis=-1, keepdims=True)
        if j == 0:
            m = s_max
            p = jnp.exp(s - m)
            l = jnp.sum(p, axis=-1, keepdims=True)
            acc = jnp.einsum("hqk,hkd->hqd", p.astype(jnp.bfloat16), v_j,
                             preferred_element_type=jnp.float32)
        else:
            m_new = jnp.maximum(m, s_max)
            alpha = jnp.exp(m - m_new)
            p = jnp.exp(s - m_new)
            l = alpha * l + jnp.sum(p, axis=-1, keepdims=True)
            acc = alpha * acc + jnp.einsum("hqk,hkd->hqd",
                                           p.astype(jnp.bfloat16), v_j,
                                           preferred_element_type=jnp.float32)
            m = m_new
    inv_l = pl.reciprocal(l, approx=True)                     # EUP slot, not VALU
    o3 = acc * inv_l                                          # (H, tq, hd) f32

    # merge heads into a lane-dense (tq, C) slab via scratch (no concat value)
    for h in range(n_head):
        y_sc[:, h * hd:(h + 1) * hd] = o3[h]

    y = jnp.dot(y_sc[...].astype(jnp.bfloat16), wap_ref[...],
                preferred_element_type=jnp.float32) + bap_ref[...]
    x1 = x_t + y                                              # residual 1 (f32)

    # ---- MLP (hidden dim processed in chunks) -------------------------------
    h2 = _layernorm(x1, ln2_g_ref[...], ln2_b_ref[...]).astype(jnp.bfloat16)
    H4 = wfc_ref.shape[1]
    macc = jnp.zeros((tq, C), jnp.float32)
    for jj in range(0, H4, mlp_chunk):
        f = jnp.dot(h2, wfc_ref[:, jj:jj + mlp_chunk],
                    preferred_element_type=jnp.float32) + bfc_ref[:, jj:jj + mlp_chunk]
        g = _gelu_tanh(f).astype(jnp.bfloat16)
        macc = macc + jnp.dot(g, wmp_ref[jj:jj + mlp_chunk, :],
                              preferred_element_type=jnp.float32)
    out = x1 + macc + bmp_ref[...]                            # residual 2 (f32)
    o_ref[...] = out.astype(o_ref.dtype)


# ------------------------------ wrapper --------------------------------------
def _encoder_block_impl(x, ln1_g, ln1_b, wq, bq, wkv, bkv, wap, bap,
                        ln2_g, ln2_b, wfc, bfc, wmp, bmp,
                        n_head, vmem_cap, single_buffer):
    B, T, C = x.shape
    hd = C // n_head

    def const_spec(arr):
        # Grid-invariant operand: one VMEM buffer is enough.
        nd = arr.ndim
        shape = arr.shape
        if single_buffer:
            return pl.BlockSpec(shape, lambda b, t: (0,) * nd,
                                pipeline_mode=pl.Buffered(1))
        return pl.BlockSpec(shape, lambda b, t: (0,) * nd)

    # ---------------- stage 1: hoisted K/V projection ------------------------
    tkv = _pick_kv_tile(T)
    nkv = T // tkv
    kv_kernel = functools.partial(_kv_proj_kernel, n_head=n_head)
    kv_grid = pltpu.PrefetchScalarGridSpec(
        num_scalar_prefetch=0,
        grid=(B, nkv),
        in_specs=[
            pl.BlockSpec((pl.Squeezed(), tkv, C), lambda b, t: (b, t, 0)),
            const_spec(ln1_g), const_spec(ln1_b),
            const_spec(wkv), const_spec(bkv),
        ],
        out_specs=[
            pl.BlockSpec((pl.Squeezed(), n_head, tkv, hd), lambda b, t: (b, 0, t, 0)),
            pl.BlockSpec((pl.Squeezed(), n_head, tkv, hd), lambda b, t: (b, 0, t, 0)),
        ],
    )
    k, v = pl.pallas_call(
        kv_kernel,
        out_shape=(jax.ShapeDtypeStruct((B, n_head, T, hd), jnp.bfloat16),
                   jax.ShapeDtypeStruct((B, n_head, T, hd), jnp.bfloat16)),
        grid_spec=kv_grid,
        compiler_params=pltpu.CompilerParams(
            dimension_semantics=("parallel", "parallel"),
            vmem_limit_bytes=_kv_vmem_bytes(T, C, tkv, n_head, vmem_cap),
        ),
    )(x, ln1_g, ln1_b, wkv, bkv)

    # ---------------- stage 2: attention + MLP -------------------------------
    tq = _pick_seq_tile(T, vmem_cap)
    nq = T // tq
    kc = _pick_k_chunk(T, vmem_cap)
    H4 = wfc.shape[1]
    mlp_chunk = _pick_mlp_chunk(H4, vmem_cap)

    kernel = functools.partial(encoder_block_kernel, n_head=n_head,
                               k_chunk=kc, mlp_chunk=mlp_chunk)

    def kv_in_spec():
        # Per-batch K/V: index only changes when b does -> single buffer is cheap.
        shape = (pl.Squeezed(), n_head, T, hd)
        if single_buffer:
            return pl.BlockSpec(shape, lambda b, q: (b, 0, 0, 0),
                                pipeline_mode=pl.Buffered(1))
        return pl.BlockSpec(shape, lambda b, q: (b, 0, 0, 0))

    grid_spec = pltpu.PrefetchScalarGridSpec(
        num_scalar_prefetch=0,
        grid=(B, nq),
        in_specs=[
            pl.BlockSpec((pl.Squeezed(), tq, C), lambda b, q: (b, q, 0)),
            const_spec(ln1_g), const_spec(ln1_b),
            const_spec(wq), const_spec(bq),
            kv_in_spec(), kv_in_spec(),
            const_spec(wap), const_spec(bap),
            const_spec(ln2_g), const_spec(ln2_b),
            const_spec(wfc), const_spec(bfc),
            const_spec(wmp), const_spec(bmp),
        ],
        out_specs=pl.BlockSpec((pl.Squeezed(), tq, C), lambda b, q: (b, q, 0)),
        scratch_shapes=[
            pltpu.VMEM((n_head, tq, hd), jnp.bfloat16),   # Q staging (head-major)
            pltpu.VMEM((tq, C), jnp.float32),             # merged-head attention output
        ],
    )

    return pl.pallas_call(
        kernel,
        out_shape=jax.ShapeDtypeStruct((B, T, C), x.dtype),
        grid_spec=grid_spec,
        compiler_params=pltpu.CompilerParams(
            # Both axes are independent now (KV hoisted, no cross-step scratch state)
            # -> megacore (v7x: 2 TCs) can split either axis.
            dimension_semantics=("parallel", "parallel"),
            vmem_limit_bytes=_main_vmem_bytes(T, C, tq, kc, n_head, mlp_chunk, vmem_cap),
        ),
    )(x, ln1_g, ln1_b, wq, bq, k, v, wap, bap,
      ln2_g, ln2_b, wfc, bfc, wmp, bmp)


def encoder_block(x, params, n_head):
    B, T, C = x.shape
    assert C % n_head == 0
    (ln1_g, ln1_b, wqkv, bqkv, wap, bap,
     ln2_g, ln2_b, wfc, bfc, wmp, bmp) = params

    hd = C // n_head
    scale = 1.0 / math.sqrt(hd)
    vmem_cap = _vmem_capacity_bytes()

    # Host-side prep: split QKV, fold 1/sqrt(hd) into the Q projection, cast matmul
    # weights to bf16 (half HBM traffic, bf16-native MXU).  LN params / biases stay f32.
    wq = (wqkv[:, :C] * scale).astype(jnp.bfloat16)
    bq = (bqkv[:, :C] * scale).astype(jnp.float32)
    wkv = wqkv[:, C:].astype(jnp.bfloat16)
    bkv = bqkv[:, C:].astype(jnp.float32)
    args = (x,
            ln1_g.astype(jnp.float32), ln1_b.astype(jnp.float32),
            wq, bq, wkv, bkv,
            wap.astype(jnp.bfloat16), bap.astype(jnp.float32),
            ln2_g.astype(jnp.float32), ln2_b.astype(jnp.float32),
            wfc.astype(jnp.bfloat16), bfc.astype(jnp.float32),
            wmp.astype(jnp.bfloat16), bmp.astype(jnp.float32))

    try:
        return _encoder_block_impl(*args, n_head=n_head, vmem_cap=vmem_cap,
                                   single_buffer=True)
    except Exception:
        # Fallback if this Pallas build rejects pipeline_mode=pl.Buffered(1).
        return _encoder_block_impl(*args, n_head=n_head, vmem_cap=vmem_cap,
                                   single_buffer=False)


# ------------------------- pure-JAX reference --------------------------------
def encoder_block_ref(x, params, n_head):
    (ln1_g, ln1_b, wqkv, bqkv, wap, bap,
     ln2_g, ln2_b, wfc, bfc, wmp, bmp) = params
    B, T, C = x.shape
    hd = C // n_head

    def ln(v, g, b):
        mu = jnp.mean(v, axis=-1, keepdims=True)
        var = jnp.mean((v - mu) ** 2, axis=-1, keepdims=True)
        return (v - mu) / jnp.sqrt(var + 1e-5) * g + b

    h = ln(x, ln1_g, ln1_b)
    qkv = h @ wqkv + bqkv
    q, k, v = jnp.split(qkv, 3, axis=-1)
    q = q.reshape(B, T, n_head, hd).transpose(0, 2, 1, 3)
    k = k.reshape(B, T, n_head, hd).transpose(0, 2, 1, 3)
    v = v.reshape(B, T, n_head, hd).transpose(0, 2, 1, 3)
    s = jnp.einsum("bhtd,bhsd->bhts", q, k) / math.sqrt(hd)
    p = jax.nn.softmax(s, axis=-1)
    y = jnp.einsum("bhts,bhsd->bhtd", p, v)
    y = y.transpose(0, 2, 1, 3).reshape(B, T, C)
    y = y @ wap + bap
    x1 = x + y

    h2 = ln(x1, ln2_g, ln2_b)
    f = h2 @ wfc + bfc
    cst = math.sqrt(2.0 / math.pi)
    f = 0.5 * f * (1.0 + jnp.tanh(cst * (f + 0.044715 * f ** 3)))
    m = f @ wmp + bmp
    return x1 + m


if __name__ == "__main__":
    B, T, C, n_head = 2, 8, 32, 4

    key = jax.random.PRNGKey(0)
    keys = jax.random.split(key, 8)

    # Deterministic synthetic parameters (weights stored as (in, out), i.e. PyTorch W.T).
    ln1_g = jnp.ones((1, C), jnp.float32)
    ln1_b = jnp.zeros((1, C), jnp.float32)
    wqkv = 0.02 * jax.random.normal(keys[0], (C, 3 * C), jnp.float32)
    bqkv = jnp.zeros((1, 3 * C), jnp.float32)
    wap = 0.02 * jax.random.normal(keys[1], (C, C), jnp.float32)
    bap = jnp.zeros((1, C), jnp.float32)
    ln2_g = jnp.ones((1, C), jnp.float32)
    ln2_b = jnp.zeros((1, C), jnp.float32)
    wfc = 0.02 * jax.random.normal(keys[2], (C, 4 * C), jnp.float32)
    bfc = jnp.zeros((1, 4 * C), jnp.float32)
    wmp = 0.02 * jax.random.normal(keys[3], (4 * C, C), jnp.float32)
    bmp = jnp.zeros((1, C), jnp.float32)

    params = (ln1_g, ln1_b, wqkv, bqkv, wap, bap,
              ln2_g, ln2_b, wfc, bfc, wmp, bmp)

    x = jax.random.normal(keys[4], (B, T, C), jnp.float32)

    out = encoder_block(x, params, n_head)
    out = jax.block_until_ready(out)

    ref = jax.block_until_ready(encoder_block_ref(x, params, n_head))
    assert out.shape == (B, T, C)
    assert jnp.allclose(out, ref, atol=2e-2, rtol=2e-2), "mismatch vs reference"

    print("KERNEL_OK")
</pallas_src>

<mosaic_0001>
module attributes {stable_mosaic.version = 11 : i64} {
  func.func @_kv_proj_kernel(%arg0: i32, %arg1: i32, %arg2: memref<1x8x32xf32, #tpu.memory_space<vmem>>, %arg3: memref<1x32xf32, #tpu.memory_space<vmem>>, %arg4: memref<1x32xf32, #tpu.memory_space<vmem>>, %arg5: memref<32x64xbf16, #tpu.memory_space<vmem>>, %arg6: memref<1x64xf32, #tpu.memory_space<vmem>>, %arg7: memref<1x4x8x8xbf16, #tpu.memory_space<vmem>>, %arg8: memref<1x4x8x8xbf16, #tpu.memory_space<vmem>>) attributes {dimension_semantics = [#tpu.dimension_semantics<parallel>, #tpu.dimension_semantics<parallel>], iteration_bounds = array<i64: 2, 1>, scalar_prefetch = 0 : i64, scratch_operands = 0 : i64, tpu.core_type = #tpu.core_type<tc>, window_params = [{transform_indices = @transform_0, window_bounds = array<i64: 1, 8, 32>}, {pipeline_mode = #tpu.pipeline_mode<synchronous>, transform_indices = @transform_1, window_bounds = array<i64: 1, 32>}, {pipeline_mode = #tpu.pipeline_mode<synchronous>, transform_indices = @transform_2, window_bounds = array<i64: 1, 32>}, {pipeline_mode = #tpu.pipeline_mode<synchronous>, transform_indices = @transform_3, window_bounds = array<i64: 32, 64>}, {pipeline_mode = #tpu.pipeline_mode<synchronous>, transform_indices = @transform_4, window_bounds = array<i64: 1, 64>}, {transform_indices = @transform_5, window_bounds = array<i64: 1, 4, 8, 8>}, {transform_indices = @transform_6, window_bounds = array<i64: 1, 4, 8, 8>}]} {
    %c0 = arith.constant 0 : index
    %c0_0 = arith.constant 0 : index
    %c0_1 = arith.constant 0 : index
    %0 = vector.load %arg2[%c0, %c0_0, %c0_1] : memref<1x8x32xf32, #tpu.memory_space<vmem>>, vector<1x8x32xf32>
    %1 = vector.shape_cast %0 : vector<1x8x32xf32> to vector<8x32xf32>
    %c0_2 = arith.constant 0 : index
    %c0_3 = arith.constant 0 : index
    %2 = vector.load %arg3[%c0_2, %c0_3] : memref<1x32xf32, #tpu.memory_space<vmem>>, vector<1x32xf32>
    %c0_4 = arith.constant 0 : index
    %c0_5 = arith.constant 0 : index
    %3 = vector.load %arg4[%c0_4, %c0_5] : memref<1x32xf32, #tpu.memory_space<vmem>>, vector<1x32xf32>
    %cst = arith.constant dense<0.000000e+00> : vector<8xf32>
    %4 = vector.multi_reduction <add>, %1, %cst [1] : vector<8x32xf32> to vector<8xf32>
    %5 = vector.shape_cast %4 : vector<8xf32> to vector<8x1xf32>
    %cst_6 = arith.constant 3.200000e+01 : f32
    %6 = vector.broadcast %cst_6 : f32 to vector<8x1xf32>
    %7 = arith.divf %5, %6 : vector<8x1xf32>
    %8 = vector.broadcast %7 : vector<8x1xf32> to vector<8x32xf32>
    %9 = arith.subf %1, %8 : vector<8x32xf32>
    %10 = arith.mulf %9, %9 : vector<8x32xf32>
    %cst_7 = arith.constant dense<0.000000e+00> : vector<8xf32>
    %11 = vector.multi_reduction <add>, %10, %cst_7 [1] : vector<8x32xf32> to vector<8xf32>
    %12 = vector.shape_cast %11 : vector<8xf32> to vector<8x1xf32>
    %cst_8 = arith.constant 3.200000e+01 : f32
    %13 = vector.broadcast %cst_8 : f32 to vector<8x1xf32>
    %14 = arith.divf %12, %13 : vector<8x1xf32>
    %15 = vector.broadcast %7 : vector<8x1xf32> to vector<8x32xf32>
    %16 = arith.subf %1, %15 : vector<8x32xf32>
    %cst_9 = arith.constant 9.99999974E-6 : f32
    %17 = vector.broadcast %cst_9 : f32 to vector<8x1xf32>
    %18 = arith.addf %14, %17 : vector<8x1xf32>
    %19 = math.rsqrt %18 : vector<8x1xf32>
    %20 = vector.broadcast %19 : vector<8x1xf32> to vector<8x32xf32>
    %21 = arith.mulf %16, %20 : vector<8x32xf32>
    %22 = vector.broadcast %2 : vector<1x32xf32> to vector<8x32xf32>
    %23 = arith.mulf %21, %22 : vector<8x32xf32>
    %24 = vector.broadcast %3 : vector<1x32xf32> to vector<8x32xf32>
    %25 = arith.addf %23, %24 : vector<8x32xf32>
    %26 = arith.truncf %25 : vector<8x32xf32> to vector<8x32xbf16>
    %c0_10 = arith.constant 0 : index
    %c0_11 = arith.constant 0 : index
    %27 = vector.load %arg5[%c0_10, %c0_11] : memref<32x64xbf16, #tpu.memory_space<vmem>>, vector<32x64xbf16>
    %cst_12 = arith.constant dense<0.000000e+00> : vector<8x64xf32>
    %28 = tpu.matmul %26, %27, %cst_12 {dimension_numbers = #tpu.dot_dimension_numbers<[1], [0], [0], [1], [0, 0, 1, 1], [], []>} : vector<8x32xbf16>, vector<32x64xbf16>, vector<8x64xf32> -> vector<8x64xf32>
    %c0_13 = arith.constant 0 : index
    %c0_14 = arith.constant 0 : index
    %29 = vector.load %arg6[%c0_13, %c0_14] : memref<1x64xf32, #tpu.memory_space<vmem>>, vector<1x64xf32>
    %30 = vector.broadcast %29 : vector<1x64xf32> to vector<8x64xf32>
    %31 = arith.addf %28, %30 : vector<8x64xf32>
    %32 = arith.truncf %31 : vector<8x64xf32> to vector<8x64xbf16>
    %33 = vector.extract_strided_slice %32 {offsets = [0, 0], sizes = [8, 8], strides = [1, 1]} : vector<8x64xbf16> to vector<8x8xbf16>
    %c0_15 = arith.constant 0 : index
    %c0_16 = arith.constant 0 : index
    %c0_17 = arith.constant 0 : index
    %c0_18 = arith.constant 0 : index
    %34 = vector.load %arg7[%c0_15, %c0_16, %c0_17, %c0_18] : memref<1x4x8x8xbf16, #tpu.memory_space<vmem>>, vector<1x1x8x8xbf16>
    %35 = vector.shape_cast %34 : vector<1x1x8x8xbf16> to vector<8x8xbf16>
    %36 = vector.shape_cast %33 : vector<8x8xbf16> to vector<1x1x8x8xbf16>
    tpu.vector_store %arg7[%c0_15, %c0_16, %c0_17, %c0_18], %36 {strides = array<i32>} : memref<1x4x8x8xbf16, #tpu.memory_space<vmem>>, vector<1x1x8x8xbf16>,
    %37 = vector.extract_strided_slice %32 {offsets = [0, 32], sizes = [8, 8], strides = [1, 1]} : vector<8x64xbf16> to vector<8x8xbf16>
    %c0_19 = arith.constant 0 : index
    %c0_20 = arith.constant 0 : index
    %c0_21 = arith.constant 0 : index
    %c0_22 = arith.constant 0 : index
    %38 = vector.load %arg8[%c0_19, %c0_20, %c0_21, %c0_22] : memref<1x4x8x8xbf16, #tpu.memory_space<vmem>>, vector<1x1x8x8xbf16>
    %39 = vector.shape_cast %38 : vector<1x1x8x8xbf16> to vector<8x8xbf16>
    %40 = vector.shape_cast %37 : vector<8x8xbf16> to vector<1x1x8x8xbf16>
    tpu.vector_store %arg8[%c0_19, %c0_20, %c0_21, %c0_22], %40 {strides = array<i32>} : memref<1x4x8x8xbf16, #tpu.memory_space<vmem>>, vector<1x1x8x8xbf16>,
    %41 = vector.extract_strided_slice %32 {offsets = [0, 8], sizes = [8, 8], strides = [1, 1]} : vector<8x64xbf16> to vector<8x8xbf16>
    %c0_23 = arith.constant 0 : index
    %c1 = arith.constant 1 : index
    %c0_24 = arith.constant 0 : index
    %c0_25 = arith.constant 0 : index
    %42 = vector.load %arg7[%c0_23, %c1, %c0_24, %c0_25] : memref<1x4x8x8xbf16, #tpu.memory_space<vmem>>, vector<1x1x8x8xbf16>
    %43 = vector.shape_cast %42 : vector<1x1x8x8xbf16> to vector<8x8xbf16>
    %44 = vector.shape_cast %41 : vector<8x8xbf16> to vector<1x1x8x8xbf16>
    tpu.vector_store %arg7[%c0_23, %c1, %c0_24, %c0_25], %44 {strides = array<i32>} : memref<1x4x8x8xbf16, #tpu.memory_space<vmem>>, vector<1x1x8x8xbf16>,
    %45 = vector.extract_strided_slice %32 {offsets = [0, 40], sizes = [8, 8], strides = [1, 1]} : vector<8x64xbf16> to vector<8x8xbf16>
    %c0_26 = arith.constant 0 : index
    %c1_27 = arith.constant 1 : index
    %c0_28 = arith.constant 0 : index
    %c0_29 = arith.constant 0 : index
    %46 = vector.load %arg8[%c0_26, %c1_27, %c0_28, %c0_29] : memref<1x4x8x8xbf16, #tpu.memory_space<vmem>>, vector<1x1x8x8xbf16>
    %47 = vector.shape_cast %46 : vector<1x1x8x8xbf16> to vector<8x8xbf16>
    %48 = vector.shape_cast %45 : vector<8x8xbf16> to vector<1x1x8x8xbf16>
    tpu.vector_store %arg8[%c0_26, %c1_27, %c0_28, %c0_29], %48 {strides = array<i32>} : memref<1x4x8x8xbf16, #tpu.memory_space<vmem>>, vector<1x1x8x8xbf16>,
    %49 = vector.extract_strided_slice %32 {offsets = [0, 16], sizes = [8, 8], strides = [1, 1]} : vector<8x64xbf16> to vector<8x8xbf16>
    %c0_30 = arith.constant 0 : index
    %c2 = arith.constant 2 : index
    %c0_31 = arith.constant 0 : index
    %c0_32 = arith.constant 0 : index
    %50 = vector.load %arg7[%c0_30, %c2, %c0_31, %c0_32] : memref<1x4x8x8xbf16, #tpu.memory_space<vmem>>, vector<1x1x8x8xbf16>
    %51 = vector.shape_cast %50 : vector<1x1x8x8xbf16> to vector<8x8xbf16>
    %52 = vector.shape_cast %49 : vector<8x8xbf16> to vector<1x1x8x8xbf16>
    tpu.vector_store %arg7[%c0_30, %c2, %c0_31, %c0_32], %52 {strides = array<i32>} : memref<1x4x8x8xbf16, #tpu.memory_space<vmem>>, vector<1x1x8x8xbf16>,
    %53 = vector.extract_strided_slice %32 {offsets = [0, 48], sizes = [8, 8], strides = [1, 1]} : vector<8x64xbf16> to vector<8x8xbf16>
    %c0_33 = arith.constant 0 : index
    %c2_34 = arith.constant 2 : index
    %c0_35 = arith.constant 0 : index
    %c0_36 = arith.constant 0 : index
    %54 = vector.load %arg8[%c0_33, %c2_34, %c0_35, %c0_36] : memref<1x4x8x8xbf16, #tpu.memory_space<vmem>>, vector<1x1x8x8xbf16>
    %55 = vector.shape_cast %54 : vector<1x1x8x8xbf16> to vector<8x8xbf16>
    %56 = vector.shape_cast %53 : vector<8x8xbf16> to vector<1x1x8x8xbf16>
    tpu.vector_store %arg8[%c0_33, %c2_34, %c0_35, %c0_36], %56 {strides = array<i32>} : memref<1x4x8x8xbf16, #tpu.memory_space<vmem>>, vector<1x1x8x8xbf16>,
    %57 = vector.extract_strided_slice %32 {offsets = [0, 24], sizes = [8, 8], strides = [1, 1]} : vector<8x64xbf16> to vector<8x8xbf16>
    %c0_37 = arith.constant 0 : index
    %c3 = arith.constant 3 : index
    %c0_38 = arith.constant 0 : index
    %c0_39 = arith.constant 0 : index
    %58 = vector.load %arg7[%c0_37, %c3, %c0_38, %c0_39] : memref<1x4x8x8xbf16, #tpu.memory_space<vmem>>, vector<1x1x8x8xbf16>
    %59 = vector.shape_cast %58 : vector<1x1x8x8xbf16> to vector<8x8xbf16>
    %60 = vector.shape_cast %57 : vector<8x8xbf16> to vector<1x1x8x8xbf16>
    tpu.vector_store %arg7[%c0_37, %c3, %c0_38, %c0_39], %60 {strides = array<i32>} : memref<1x4x8x8xbf16, #tpu.memory_space<vmem>>, vector<1x1x8x8xbf16>,
    %61 = vector.extract_strided_slice %32 {offsets = [0, 56], sizes = [8, 8], strides = [1, 1]} : vector<8x64xbf16> to vector<8x8xbf16>
    %c0_40 = arith.constant 0 : index
    %c3_41 = arith.constant 3 : index
    %c0_42 = arith.constant 0 : index
    %c0_43 = arith.constant 0 : index
    %62 = vector.load %arg8[%c0_40, %c3_41, %c0_42, %c0_43] : memref<1x4x8x8xbf16, #tpu.memory_space<vmem>>, vector<1x1x8x8xbf16>
    %63 = vector.shape_cast %62 : vector<1x1x8x8xbf16> to vector<8x8xbf16>
    %64 = vector.shape_cast %61 : vector<8x8xbf16> to vector<1x1x8x8xbf16>
    tpu.vector_store %arg8[%c0_40, %c3_41, %c0_42, %c0_43], %64 {strides = array<i32>} : memref<1x4x8x8xbf16, #tpu.memory_space<vmem>>, vector<1x1x8x8xbf16>,
    return
  }
  func.func @transform_0(%arg0: i32, %arg1: i32) -> (i32, i32, i32) {
    %c0_i32 = arith.constant 0 : i32
    %c0_i32_0 = arith.constant 0 : i32
    return %arg0, %arg1, %c0_i32 : i32, i32, i32
  }
  func.func @transform_1(%arg0: i32, %arg1: i32) -> (i32, i32) {
    %c0_i32 = arith.constant 0 : i32
    %c0_i32_0 = arith.constant 0 : i32
    %c0_i32_1 = arith.constant 0 : i32
    return %c0_i32, %c0_i32_0 : i32, i32
  }
  func.func @transform_2(%arg0: i32, %arg1: i32) -> (i32, i32) {
    %c0_i32 = arith.constant 0 : i32
    %c0_i32_0 = arith.constant 0 : i32
    %c0_i32_1 = arith.constant 0 : i32
    return %c0_i32, %c0_i32_0 : i32, i32
  }
  func.func @transform_3(%arg0: i32, %arg1: i32) -> (i32, i32) {
    %c0_i32 = arith.constant 0 : i32
    %c0_i32_0 = arith.constant 0 : i32
    %c0_i32_1 = arith.constant 0 : i32
    return %c0_i32, %c0_i32_0 : i32, i32
  }
  func.func @transform_4(%arg0: i32, %arg1: i32) -> (i32, i32) {
    %c0_i32 = arith.constant 0 : i32
    %c0_i32_0 = arith.constant 0 : i32
    %c0_i32_1 = arith.constant 0 : i32
    return %c0_i32, %c0_i32_0 : i32, i32
  }
  func.func @transform_5(%arg0: i32, %arg1: i32) -> (i32, i32, i32, i32) {
    %c0_i32 = arith.constant 0 : i32
    %c0_i32_0 = arith.constant 0 : i32
    %c0_i32_1 = arith.constant 0 : i32
    return %arg0, %c0_i32, %arg1, %c0_i32_0 : i32, i32, i32, i32
  }
  func.func @transform_6(%arg0: i32, %arg1: i32) -> (i32, i32, i32, i32) {
    %c0_i32 = arith.constant 0 : i32
    %c0_i32_0 = arith.constant 0 : i32
    %c0_i32_1 = arith.constant 0 : i32
    return %arg0, %c0_i32, %arg1, %c0_i32_0 : i32, i32, i32, i32
  }
}

module attributes {stable_mosaic.version = 11 : i64} {
  func.func @_kv_proj_kernel(%arg0: i32, %arg1: i32, %arg2: memref<1x8x32xf32, #tpu.memory_space<vmem>>, %arg3: memref<1x32xf32, #tpu.memory_space<vmem>>, %arg4: memref<1x32xf32, #tpu.memory_space<vmem>>, %arg5: memref<32x64xbf16, #tpu.memory_space<vmem>>, %arg6: memref<1x64xf32, #tpu.memory_space<vmem>>, %arg7: memref<1x4x8x8xbf16, #tpu.memory_space<vmem>>, %arg8: memref<1x4x8x8xbf16, #tpu.memory_space<vmem>>) attributes {dimension_semantics = [#tpu.dimension_semantics<parallel>, #tpu.dimension_semantics<parallel>], iteration_bounds = array<i64: 2, 1>, scalar_prefetch = 0 : i64, scratch_operands = 0 : i64, tpu.core_type = #tpu.core_type<tc>, window_params = [{transform_indices = @transform_0, window_bounds = array<i64: 1, 8, 32>}, {pipeline_mode = #tpu.pipeline_mode<synchronous>, transform_indices = @transform_1, window_bounds = array<i64: 1, 32>}, {pipeline_mode = #tpu.pipeline_mode<synchronous>, transform_indices = @transform_2, window_bounds = array<i64: 1, 32>}, {pipeline_mode = #tpu.pipeline_mode<synchronous>, transform_indices = @transform_3, window_bounds = array<i64: 32, 64>}, {pipeline_mode = #tpu.pipeline_mode<synchronous>, transform_indices = @transform_4, window_bounds = array<i64: 1, 64>}, {transform_indices = @transform_5, window_bounds = array<i64: 1, 4, 8, 8>}, {transform_indices = @transform_6, window_bounds = array<i64: 1, 4, 8, 8>}]} {
    %c0 = arith.constant 0 : index
    %c0_0 = arith.constant 0 : index
    %c0_1 = arith.constant 0 : index
    %0 = vector.load %arg2[%c0, %c0_0, %c0_1] : memref<1x8x32xf32, #tpu.memory_space<vmem>>, vector<1x8x32xf32>
    %1 = vector.shape_cast %0 : vector<1x8x32xf32> to vector<8x32xf32>
    %c0_2 = arith.constant 0 : index
    %c0_3 = arith.constant 0 : index
    %2 = vector.load %arg3[%c0_2, %c0_3] : memref<1x32xf32, #tpu.memory_space<vmem>>, vector<1x32xf32>
    %c0_4 = arith.constant 0 : index
    %c0_5 = arith.constant 0 : index
    %3 = vector.load %arg4[%c0_4, %c0_5] : memref<1x32xf32, #tpu.memory_space<vmem>>, vector<1x32xf32>
    %cst = arith.constant dense<0.000000e+00> : vector<8xf32>
    %4 = vector.multi_reduction <add>, %1, %cst [1] : vector<8x32xf32> to vector<8xf32>
    %5 = vector.shape_cast %4 : vector<8xf32> to vector<8x1xf32>
    %cst_6 = arith.constant 3.200000e+01 : f32
    %6 = vector.broadcast %cst_6 : f32 to vector<8x1xf32>
    %7 = arith.divf %5, %6 : vector<8x1xf32>
    %8 = vector.broadcast %7 : vector<8x1xf32> to vector<8x32xf32>
    %9 = arith.subf %1, %8 : vector<8x32xf32>
    %10 = arith.mulf %9, %9 : vector<8x32xf32>
    %cst_7 = arith.constant dense<0.000000e+00> : vector<8xf32>
    %11 = vector.multi_reduction <add>, %10, %cst_7 [1] : vector<8x32xf32> to vector<8xf32>
    %12 = vector.shape_cast %11 : vector<8xf32> to vector<8x1xf32>
    %cst_8 = arith.constant 3.200000e+01 : f32
    %13 = vector.broadcast %cst_8 : f32 to vector<8x1xf32>
    %14 = arith.divf %12, %13 : vector<8x1xf32>
    %15 = vector.broadcast %7 : vector<8x1xf32> to vector<8x32xf32>
    %16 = arith.subf %1, %15 : vector<8x32xf32>
    %cst_9 = arith.constant 9.99999974E-6 : f32
    %17 = vector.broadcast %cst_9 : f32 to vector<8x1xf32>
    %18 = arith.addf %14, %17 : vector<8x1xf32>
    %19 = math.rsqrt %18 : vector<8x1xf32>
    %20 = vector.broadcast %19 : vector<8x1xf32> to vector<8x32xf32>
    %21 = arith.mulf %16, %20 : vector<8x32xf32>
    %22 = vector.broadcast %2 : vector<1x32xf32> to vector<8x32xf32>
    %23 = arith.mulf %21, %22 : vector<8x32xf32>
    %24 = vector.broadcast %3 : vector<1x32xf32> to vector<8x32xf32>
    %25 = arith.addf %23, %24 : vector<8x32xf32>
    %26 = arith.truncf %25 : vector<8x32xf32> to vector<8x32xbf16>
    %c0_10 = arith.constant 0 : index
    %c0_11 = arith.constant 0 : index
    %27 = vector.load %arg5[%c0_10, %c0_11] : memref<32x64xbf16, #tpu.memory_space<vmem>>, vector<32x64xbf16>
    %cst_12 = arith.constant dense<0.000000e+00> : vector<8x64xf32>
    %28 = tpu.matmul %26, %27, %cst_12 {dimension_numbers = #tpu.dot_dimension_numbers<[1], [0], [0], [1], [0, 0, 1, 1], [], []>} : vector<8x32xbf16>, vector<32x64xbf16>, vector<8x64xf32> -> vector<8x64xf32>
    %c0_13 = arith.constant 0 : index
    %c0_14 = arith.constant 0 : index
    %29 = vector.load %arg6[%c0_13, %c0_14] : memref<1x64xf32, #tpu.memory_space<vmem>>, vector<1x64xf32>
    %30 = vector.broadcast %29 : vector<1x64xf32> to vector<8x64xf32>
    %31 = arith.addf %28, %30 : vector<8x64xf32>
    %32 = arith.truncf %31 : vector<8x64xf32> to vector<8x64xbf16>
    %33 = vector.extract_strided_slice %32 {offsets = [0, 0], sizes = [8, 8], strides = [1, 1]} : vector<8x64xbf16> to vector<8x8xbf16>
    %c0_15 = arith.constant 0 : index
    %c0_16 = arith.constant 0 : index
    %c0_17 = arith.constant 0 : index
    %c0_18 = arith.constant 0 : index
    %34 = vector.load %arg7[%c0_15, %c0_16, %c0_17, %c0_18] : memref<1x4x8x8xbf16, #tpu.memory_space<vmem>>, vector<1x1x8x8xbf16>
    %35 = vector.shape_cast %34 : vector<1x1x8x8xbf16> to vector<8x8xbf16>
    %36 = vector.shape_cast %33 : vector<8x8xbf16> to vector<1x1x8x8xbf16>
    tpu.vector_store %arg7[%c0_15, %c0_16, %c0_17, %c0_18], %36 {strides = array<i32>} : memref<1x4x8x8xbf16, #tpu.memory_space<vmem>>, vector<1x1x8x8xbf16>,
    %37 = vector.extract_strided_slice %32 {offsets = [0, 32], sizes = [8, 8], strides = [1, 1]} : vector<8x64xbf16> to vector<8x8xbf16>
    %c0_19 = arith.constant 0 : index
    %c0_20 = arith.constant 0 : index
    %c0_21 = arith.constant 0 : index
    %c0_22 = arith.constant 0 : index
    %38 = vector.load %arg8[%c0_19, %c0_20, %c0_21, %c0_22] : memref<1x4x8x8xbf16, #tpu.memory_space<vmem>>, vector<1x1x8x8xbf16>
    %39 = vector.shape_cast %38 : vector<1x1x8x8xbf16> to vector<8x8xbf16>
    %40 = vector.shape_cast %37 : vector<8x8xbf16> to vector<1x1x8x8xbf16>
    tpu.vector_store %arg8[%c0_19, %c0_20, %c0_21, %c0_22], %40 {strides = array<i32>} : memref<1x4x8x8xbf16, #tpu.memory_space<vmem>>, vector<1x1x8x8xbf16>,
    %41 = vector.extract_strided_slice %32 {offsets = [0, 8], sizes = [8, 8], strides = [1, 1]} : vector<8x64xbf16> to vector<8x8xbf16>
    %c0_23 = arith.constant 0 : index
    %c1 = arith.constant 1 : index
    %c0_24 = arith.constant 0 : index
    %c0_25 = arith.constant 0 : index
    %42 = vector.load %arg7[%c0_23, %c1, %c0_24, %c0_25] : memref<1x4x8x8xbf16, #tpu.memory_space<vmem>>, vector<1x1x8x8xbf16>
    %43 = vector.shape_cast %42 : vector<1x1x8x8xbf16> to vector<8x8xbf16>
    %44 = vector.shape_cast %41 : vector<8x8xbf16> to vector<1x1x8x8xbf16>
    tpu.vector_store %arg7[%c0_23, %c1, %c0_24, %c0_25], %44 {strides = array<i32>} : memref<1x4x8x8xbf16, #tpu.memory_space<vmem>>, vector<1x1x8x8xbf16>,
    %45 = vector.extract_strided_slice %32 {offsets = [0, 40], sizes = [8, 8], strides = [1, 1]} : vector<8x64xbf16> to vector<8x8xbf16>
    %c0_26 = arith.constant 0 : index
    %c1_27 = arith.constant 1 : index
    %c0_28 = arith.constant 0 : index
    %c0_29 = arith.constant 0 : index
    %46 = vector.load %arg8[%c0_26, %c1_27, %c0_28, %c0_29] : memref<1x4x8x8xbf16, #tpu.memory_space<vmem>>, vector<1x1x8x8xbf16>
    %47 = vector.shape_cast %46 : vector<1x1x8x8xbf16> to vector<8x8xbf16>
    %48 = vector.shape_cast %45 : vector<8x8xbf16> to vector<1x1x8x8xbf16>
    tpu.vector_store %arg8[%c0_26, %c1_27, %c0_28, %c0_29], %48 {strides = array<i32>} : memref<1x4x8x8xbf16, #tpu.memory_space<vmem>>, vector<1x1x8x8xbf16>,
    %49 = vector.extract_strided_slice %32 {offsets = [0, 16], sizes = [8, 8], strides = [1, 1]} : vector<8x64xbf16> to vector<8x8xbf16>
    %c0_30 = arith.constant 0 : index
    %c2 = arith.constant 2 : index
    %c0_31 = arith.constant 0 : index
    %c0_32 = arith.constant 0 : index
    %50 = vector.load %arg7[%c0_30, %c2, %c0_31, %c0_32] : memref<1x4x8x8xbf16, #tpu.memory_space<vmem>>, vector<1x1x8x8xbf16>
    %51 = vector.shape_cast %50 : vector<1x1x8x8xbf16> to vector<8x8xbf16>
    %52 = vector.shape_cast %49 : vector<8x8xbf16> to vector<1x1x8x8xbf16>
    tpu.vector_store %arg7[%c0_30, %c2, %c0_31, %c0_32], %52 {strides = array<i32>} : memref<1x4x8x8xbf16, #tpu.memory_space<vmem>>, vector<1x1x8x8xbf16>,
    %53 = vector.extract_strided_slice %32 {offsets = [0, 48], sizes = [8, 8], strides = [1, 1]} : vector<8x64xbf16> to vector<8x8xbf16>
    %c0_33 = arith.constant 0 : index
    %c2_34 = arith.constant 2 : index
    %c0_35 = arith.constant 0 : index
    %c0_36 = arith.constant 0 : index
    %54 = vector.load %arg8[%c0_33, %c2_34, %c0_35, %c0_36] : memref<1x4x8x8xbf16, #tpu.memory_space<vmem>>, vector<1x1x8x8xbf16>
    %55 = vector.shape_cast %54 : vector<1x1x8x8xbf16> to vector<8x8xbf16>
    %56 = vector.shape_cast %53 : vector<8x8xbf16> to vector<1x1x8x8xbf16>
    tpu.vector_store %arg8[%c0_33, %c2_34, %c0_35, %c0_36], %56 {strides = array<i32>} : memref<1x4x8x8xbf16, #tpu.memory_space<vmem>>, vector<1x1x8x8xbf16>,
    %57 = vector.extract_strided_slice %32 {offsets = [0, 24], sizes = [8, 8], strides = [1, 1]} : vector<8x64xbf16> to vector<8x8xbf16>
    %c0_37 = arith.constant 0 : index
    %c3 = arith.constant 3 : index
    %c0_38 = arith.constant 0 : index
    %c0_39 = arith.constant 0 : index
    %58 = vector.load %arg7[%c0_37, %c3, %c0_38, %c0_39] : memref<1x4x8x8xbf16, #tpu.memory_space<vmem>>, vector<1x1x8x8xbf16>
    %59 = vector.shape_cast %58 : vector<1x1x8x8xbf16> to vector<8x8xbf16>
    %60 = vector.shape_cast %57 : vector<8x8xbf16> to vector<1x1x8x8xbf16>
    tpu.vector_store %arg7[%c0_37, %c3, %c0_38, %c0_39], %60 {strides = array<i32>} : memref<1x4x8x8xbf16, #tpu.memory_space<vmem>>, vector<1x1x8x8xbf16>,
    %61 = vector.extract_strided_slice %32 {offsets = [0, 56], sizes = [8, 8], strides = [1, 1]} : vector<8x64xbf16> to vector<8x8xbf16>
    %c0_40 = arith.constant 0 : index
    %c3_41 = arith.constant 3 : index
    %c0_42 = arith.constant 0 : index
    %c0_43 = arith.constant 0 : index
    %62 = vector.load %arg8[%c0_40, %c3_41, %c0_42, %c0_43] : memref<1x4x8x8xbf16, #tpu.memory_space<vmem>>, vector<1x1x8x8xbf16>
    %63 = vector.shape_cast %62 : vector<1x1x8x8xbf16> to vector<8x8xbf16>
    %64 = vector.shape_cast %61 : vector<8x8xbf16> to vector<1x1x8x8xbf16>
    tpu.vector_store %arg8[%c0_40, %c3_41, %c0_42, %c0_43], %64 {strides = array<i32>} : memref<1x4x8x8xbf16, #tpu.memory_space<vmem>>, vector<1x1x8x8xbf16>,
    return
  }
  func.func @transform_0(%arg0: i32, %arg1: i32) -> (i32, i32, i32) {
    %c0_i32 = arith.constant 0 : i32
    %c0_i32_0 = arith.constant 0 : i32
    return %arg0, %arg1, %c0_i32 : i32, i32, i32
  }
  func.func @transform_1(%arg0: i32, %arg1: i32) -> (i32, i32) {
    %c0_i32 = arith.constant 0 : i32
    %c0_i32_0 = arith.constant 0 : i32
    %c0_i32_1 = arith.constant 0 : i32
    return %c0_i32, %c0_i32_0 : i32, i32
  }
  func.func @transform_2(%arg0: i32, %arg1: i32) -> (i32, i32) {
    %c0_i32 = arith.constant 0 : i32
    %c0_i32_0 = arith.constant 0 : i32
    %c0_i32_1 = arith.constant 0 : i32
    return %c0_i32, %c0_i32_0 : i32, i32
  }
  func.func @transform_3(%arg0: i32, %arg1: i32) -> (i32, i32) {
    %c0_i32 = arith.constant 0 : i32
    %c0_i32_0 = arith.constant 0 : i32
    %c0_i32_1 = arith.constant 0 : i32
    return %c0_i32, %c0_i32_0 : i32, i32
  }
  func.func @transform_4(%arg0: i32, %arg1: i32) -> (i32, i32) {
    %c0_i32 = arith.constant 0 : i32
    %c0_i32_0 = arith.constant 0 : i32
    %c0_i32_1 = arith.constant 0 : i32
    return %c0_i32, %c0_i32_0 : i32, i32
  }
  func.func @transform_5(%arg0: i32, %arg1: i32) -> (i32, i32, i32, i32) {
    %c0_i32 = arith.constant 0 : i32
    %c0_i32_0 = arith.constant 0 : i32
    %c0_i32_1 = arith.constant 0 : i32
    return %arg0, %c0_i32, %arg1, %c0_i32_0 : i32, i32, i32, i32
  }
  func.func @transform_6(%arg0: i32, %arg1: i32) -> (i32, i32, i32, i32) {
    %c0_i32 = arith.constant 0 : i32
    %c0_i32_0 = arith.constant 0 : i32
    %c0_i32_1 = arith.constant 0 : i32
    return %arg0, %c0_i32, %arg1, %c0_i32_0 : i32, i32, i32, i32
  }
}

</mosaic_0001>

<bundles_post_ra>
// kernel: tpu_custom_call.1
= control target key start
LH: loop header
LB: loop body
LE: loop exit
PB: predicated region body
PF: predicated region fallthrough
CT: control target
= control target key end

     0   :  { %s1281_s0 = inlined_call_operand.hbm [shape: f32[2,8,32], index: 0, kind: input, shape index: {}]   ;;  %s1282_s1 = inlined_call_operand.vmem [shape: f32[1,32], index: 1, kind: input, shape index: {}]   ;;  %s1283_s2 = inlined_call_operand.vmem [shape: f32[1,32], index: 2, kind: input, shape index: {}]   ;;  %s1284_s3 = inlined_call_operand.hbm [shape: bf16[32,64], index: 3, kind: input, shape index: {}]   ;;  %s1285_s4 = inlined_call_operand.vmem [shape: f32[1,64], index: 4, kind: input, shape index: {}]   ;;  %s1286_s5 = inlined_call_operand.hbm [shape: bf16[2,4,8,8], index: 5, kind: output, shape index: {0}]   ;;  %s1287_s6 = inlined_call_operand.hbm [shape: bf16[2,4,8,8], index: 6, kind: output, shape index: {1}]  }
   0x1   :  { %1292 = sst [smem:[#allocation14_spill]] %s1281_s0 }
   0x2   :  { %1293 = sst [smem:[#allocation15_spill]] %s1282_s1 }
   0x3   :  { %1294 = sst [smem:[#allocation16_spill]] %s1284_s3 }
   0x4   :  { %12 = vsyncpa [#allocation3], 0 }
   0x5   :  { %14 = vsyncpa [#allocation3 + $0x1], 0 }
   0x6   :  { %15 = vsyncpa [#allocation6], 0 }
   0x7   :  { %16 = vsyncpa [#allocation4], 0 }
   0x8   :  { %18 = vsyncpa [#allocation4 + $0x1], 0 }
   0x9   :  { %19 = vsyncpa [#allocation9], 0 }
   0xa   :  { %21 = vsyncpa [#allocation9 + $0x1], 0  ;;  %s989_s21 = smov 0   ;;  %s991_s22 = smov 0  }
   0xb   :  { %s993_s23 = smov 0   ;;  %s995_s24 = smov 0  }
   0xc   :  { %s997_s25 = smov 0   ;;  %s999_s26 = smov 0  }
   0xd LB: > { %s617_s27 = sadd.s32 4294967295, %s935_s26   ;;  %s618_s28 = sadd.s32 4294967294, %s935_s26   ;;  %s935_s26 = sphi %s999_s26, %s27_s26   ;;  %s931_s25 = sphi %s997_s25, %s1317_s25   ;;  %s927_s24 = sphi %s995_s24, %s1316_s24   ;;  %s923_s23 = sphi %s993_s23, %s1315_s23   ;;  %s919_s22 = sphi %s991_s22, %s1314_s22   ;;  %s915_s21 = sphi %s989_s21, %s1313_s21  }
   0xe   : > { %p61_p0 = scmp.ne.s32.totalorder %s919_s22, %s915_s21  ;;  %p1023_p1 = scmp.eq.s32.totalorder %s617_s27, 0 }
   0xf   : > { %p1027_p2 = scmp.eq.s32.totalorder %s617_s27, 1  ;;  %p177_p3 = scmp.eq.s32.totalorder %s618_s28, 1 }
  0x10   : > { %s1295_s29 = scalar_select %p1023_p1, 1, 0 }
  0x11   : > { %s1296_s30 = scalar_select %p1027_p2, 1, 0 }
  0x12   : > { %p1033_p4 = por %p1023_p1, %p61_p0  ;;  %p619_p5 = scmp.ge.s32.totalorder %s935_s26, 1 }
  0x13   : > { %p1038_p6 = por %p177_p3, %p61_p0  ;;  %p212_p7 = scmp.lt.s32.totalorder %s935_s26, 3 }
  0x14   : > { %s1297_s7 = scalar_select %p1033_p4, 1, 0 }
  0x15   : > { %s1298_s8 = scalar_select %p1038_p6, 1, 0 }
  0x16   : > { %p1043_p8 = pnand %p619_p5, %p212_p7  ;;  %s937_s10 = smov [#allocation5]  }
  0x17   : > { %s230_s11 = sshll.u32 %s937_s10, 4  ;;  %s39_s13 = sadd.s32 1, %s931_s25  ;;  %s231_s11 = int_to_ptr.vmem [resolvable:$true] %s230_s11 }
  0x18   : > { %s1299_s9 = scalar_select %p1043_p8, 1, 0 }
  0x19   : > { %p674_p9 = pneg %p1043_p8  ;;  %s1301_s3 = sld [smem:[#allocation16_spill]] }
  0x1b   : > { %p1052_p11 = pnand %p674_p9, %p1023_p1 }
  0x1d   : > { %p761_p13 = pneg %p1052_p11 }
  0x1f   : > { %s759_s16 = scalar_lea.hbm %s1301_s3, 256 }
  0x20   : > { %p760_p12 = scmp.ne.s32.totalorder %s1301_s3, %s759_s16  ;;  %p766_p5 = scmp.lt.u32.totalorder %s759_s16, %s1301_s3 }
  0x22   : > { %p762_p0 = pnand %p761_p13, %p760_p12 }
  0x24   : > { %p763_p3 = pneg %p762_p0 }
  0x26   : > { %p768_p7 = pnand %p766_p5, %p763_p3 }
  0x28   : > { %771 = shalt.err (!%p768_p7)
}
  0x29   : > { %s772_s27 = scalar_lea.vmem %s231_s11, 256  ;;  %p780_p1 = scmp.lt.s32.totalorder %s231_s11, %s231_s11 }
  0x2a   : > { %p773_p9 = scmp.ne.s32.totalorder %s231_s11, %s772_s27  ;;  %p781_p4 = scmp.lt.s32.totalorder %s772_s27, %s772_s27 }
  0x2c   : > { %p775_p10 = pnand %p773_p9, %p761_p13  ;;  %p782_p8 = por %p781_p4, %p780_p1 }
  0x2e   : > { %p776_p6 = pneg %p775_p10 }
  0x30   : > { %p783_p2 = pnand %p782_p8, %p776_p6 }
  0x32   : > { %786 = shalt.err (!%p783_p2)
}
  0x33   : > { %s938_s28 = smov 64   ;;  %s939_s10 = smov 4  }
  0x34   : > { %677 = dma.hbm_to_vmem [thread:$0]  (!%p1052_p11), %s1301_s3, 256, %s231_s11, [#allocation6], %s938_s28, %s938_s28, %s939_s10  }
  0x35   : > { %p41_p1 = scmp.ge.s32.totalorder %s39_s13, 2  ;;  %s48_s16 = sadd.s32 1, %s923_s23 }
  0x36   : > { %p55_p2 = scmp.ne.s32.totalorder %s923_s23, %s919_s22  ;;  %p56_p4 = scmp.eq.s32.totalorder %s935_s26, 0 }
  0x37   : > { %s1319_s13 = smov (%p41_p1, %s39_s13), 0  ;;  %p1303_p8 = scmp.ne.s32.totalorder %s1296_s30, 0 }
  0x38   : > { %p1079_p6 = por %p56_p4, %p55_p2  ;;  %s43_s12 = ssub.s32 %s931_s25, %s1319_s13 }
  0x39   : > { %p1085_p10 = por %p1303_p8, %p55_p2  ;;  %p690_p12 = scmp.lt.s32.totalorder %s935_s26, 2 }
  0x3a   : > { %p46_p11 = scmp.eq.s32.totalorder %s43_s12, 0  ;;  %s247_s11 = sand.u32 1, %s923_s23  }
  0x3b   : > { %s622_s19 = sshll.u32 %s247_s11, 3  ;;  %s623_s27 = sshll.u32 %s931_s25, 7 }
  0x3c   : > { %s1094_s20 = scalar_select %p46_p11, %s923_s23, %s48_s16  }
  0x3d   : > { %s1305_s0 = sld [smem:[#allocation14_spill]]  ;;  %s251_s30 = scalar_lea.vmem [#allocation2], %s622_s19 }
  0x3e   : > { %s259_s15 = sshll.u32 %s251_s30, 4  ;;  %p1106_p13 = pnand %p690_p12, %p1079_p6  ;;  %s1102_s15 = int_to_ptr.vmem [resolvable:$true] %s259_s15 }
  0x3f   : > { %s248_s16 = scalar_lea.sflag [#allocation3], %s247_s11 }
  0x40   : > { %p789_p3 = pneg %p1106_p13 }
  0x43   : > { %s1100_s14 = scalar_lea.hbm %s1305_s0, %s623_s27  ;;  %s792_s28 = scalar_lea.hbm %s1305_s0, 256 }
  0x44   : > { %s787_s3 = scalar_lea.hbm %s1100_s14, 128  ;;  %p793_p9 = scmp.lt.u32.totalorder %s1100_s14, %s1305_s0 }
  0x45   : > { %p788_p0 = scmp.ne.s32.totalorder %s1100_s14, %s787_s3  ;;  %p794_p1 = scmp.lt.u32.totalorder %s792_s28, %s787_s3 }
  0x46   : > { %p796_p4 = scmp.lt.u32.totalorder %s787_s3, %s1100_s14 }
  0x47   : > { %p790_p5 = pnand %p789_p3, %p788_p0  ;;  %p795_p2 = por %p794_p1, %p793_p9 }
  0x49   : > { %p791_p7 = pneg %p790_p5  ;;  %p797_p6 = por %p796_p4, %p795_p2 }
  0x4b   : > { %p798_p8 = pnand %p797_p6, %p791_p7 }
  0x4d   : > { %801 = shalt.err (!%p798_p8)
}
  0x4e   : > { %s802_s11 = scalar_lea.vmem %s1102_s15, 128  ;;  %s940_s30 = smov [#allocation2]  }
  0x4f   : > { %p803_p12 = scmp.ne.s32.totalorder %s1102_s15, %s802_s11  ;;  %s807_s19 = sshll.u32 %s940_s30, 4  ;;  %s808_s19 = int_to_ptr.vmem [resolvable:$false] %s807_s19 }
  0x50   : > { %s809_s27 = scalar_lea.vmem %s808_s19, 256  ;;  %p810_p5 = scmp.lt.s32.totalorder %s1102_s15, %s808_s19 }
  0x51   : > { %p805_p11 = pnand %p803_p12, %p789_p3  ;;  %p811_p9 = scmp.lt.s32.totalorder %s809_s27, %s802_s11 }
  0x53   : > { %p806_p0 = pneg %p805_p11  ;;  %p812_p1 = por %p811_p9, %p810_p5 }
  0x55   : > { %p813_p2 = pnand %p812_p1, %p806_p0 }
  0x57   : > { %816 = shalt.err (!%p813_p2)
}
  0x58   : > { %681 = dma.hbm_to_vmem [thread:$0]  (!%p1106_p13), %s1100_s14, 128, %s1102_s15, %s248_s16  }
  0x59   : > { %p1307_p7 = scmp.ne.s32.totalorder %s1299_s9, 0 }
  0x5a   : > { %s1138_s3 = sand.u32 (!%p1307_p7), 1, %s919_s22   ;;  %p1308_p3 = scmp.ne.s32.totalorder (!%p1307_p7), %s1297_s7, 0 }
  0x5b   : > { %268 = sbr.rel (%p1307_p7) target bundleno = 803 (0x323), region = 40  ;;  %s625_s28 = sshll.u32 (!%p1307_p7), %s1138_s3, 3 }
  0x5c   : > { %s271_s17 = scalar_lea.sflag (!%p1307_p7), [#allocation3], %s1138_s3  ;;  %s274_s10 = scalar_lea.vmem (!%p1307_p7), [#allocation2], %s625_s28 }
  0x62   : > { %898 = dma.done.wait (%p1308_p3), %s271_s17, 128  }
  0x63   : > { %900 = vsyncadd (%p1308_p3), %s271_s17, 4294967168  ;;  %p1309_p4 = scmp.ne.s32.totalorder %s1295_s29, 0 }
  0x65   : > { %902 = dma.done.wait (%p1309_p4), [#allocation6], 256  }
  0x66   : > { %904 = vsyncadd (%p1309_p4), [#allocation6], 4294967040  ;;  %vm316_vm0 = vcmask 261120   ;;  %v313_v0 = vld [vmem:[%s274_s10] sm:$0xff]  ;;  %v755_v7 = vld [vmem:[#allocation5] sm:$0xff]   ;;  %v941_v8 = vmov 0.0  }
  0x67   : > { %v317_v1 = vsel %vm316_vm0, %v313_v0, 0.0  ;;  %656 = vmatprep.subr.bf16.mxu0 %v941_v8  ;;  %vm942_vm1 = vmmov 0   ;;  %v756_v9 = vld [vmem:[#allocation5 + $0x8] sm:$0xff]   ;;  %s1310_s1 = sld [smem:[#allocation15_spill]]  ;;  %v630_v16 = vld [vmem:[%s1283_s2] ss:$0 sm:$0xff] }
  0x68   : > { %318 = vadd.xlane.f32.xlu0 %v317_v1  ;;  %660 = vmatprep.mubr.msk.bf16.mxu0 %vm942_vm1, %v941_v8  ;;  %v631_v20 = vld [vmem:[%s1285_s4] ss:$0 sm:$0xff]  ;;  %s627_s16 = sshll.u32 %s1138_s3, 4  ;;  %vm413_vm2 = vcmask 60416   ;;  %s943_s11 = smov 88  }
  0x69   : > { %657 = vmatpush3.bf16.msra.mxu0 %v755_v7  ;;  %s944_s30 = smov 96   ;;  %s1163_s19 = scalar_lea.vmem [#allocation7], %s627_s16 }
  0x6a   : > { %658 = vmatprep.subr.bf16.mxu0 %v941_v8  ;;  %s945_s27 = smov 120   ;;  %s946_s28 = smov 112  }
  0x6b   : > { %s947_s17 = smov 80   ;;  %s948_s10 = smov 104  }
  0x6c   : > { %s949_s29 = smov 72   ;;  %s1167_s7 = scalar_lea.vmem [#allocation8], %s627_s16 }
  0x6d   : > { %659 = vmatpush3.bf16.msra.mxu0 %v756_v9  ;;  %v629_v14 = vld [vmem:[%s1310_s1] ss:$0 sm:$0xff]  ;;  %s472_s9 = sshll.u32 %s1163_s19, 4  ;;  %s651_s14 = sshll.u32 %s927_s24, 8  ;;  %s1180_s9 = int_to_ptr.vmem [resolvable:$true] %s472_s9 }
  0x6e   : > { %s489_s15 = sshll.u32 %s1167_s7, 4  ;;  %s1191_s15 = int_to_ptr.vmem [resolvable:$true] %s489_s15 }
  0xf5   : > { %v319_v2 = vpop.xlane.xlu0 %318 }
  0xf6   : > { %v321_v3 = vmul.f32 0.03125, %v319_v2 }
  0xf8   : > { %v322_v4 = vsub.f32 %v313_v0, %v321_v3 }
  0xfa   : > { %v323_v5 = vmul.f32 %v322_v4, %v322_v4 }
  0xfc   : > { %v324_v6 = vsel %vm316_vm0, %v323_v5, 0.0 }
  0xfd   : > { %325 = vadd.xlane.f32.xlu0 %v324_v6 }
 0x18a   : > { %v326_v10 = vpop.xlane.xlu0 %325 }
 0x18b   : > { %v327_v11 = vmul.f32 0.03125, %v326_v10 }
 0x18d   : > { %v328_v12 = vadd.f32 1e-05, %v327_v11 }
 0x18f   : > { %757 = vrsqrt.f32 %v328_v12 }
 0x199   : > { %v758_v13 = vpop.eup %757 }
 0x19a   : > { %v330_v15 = vmul.f32 %v758_v13, %v322_v4 }
 0x19c   : > { %v337_v17 = vmul.f32 %v629_v14, %v330_v15 }
 0x19e   : > { %v344_v18 = vadd.f32 %v630_v16, %v337_v17 }
 0x1a0   : > { %v345_v19 = vpack.c.bf16 %v344_v18, %v344_v18 }
 0x1a2   : > { %661 = vmatmul.mubr.msk.bf16.vlgmr.msra.gmra.mrb[0].mxu0 %vm316_vm0, %v345_v19 }
 0x275   : > { %v406_v21 = vpop.f32.mrb[0].mxu0 }
 0x276   : > { %v407_v22 = vadd.f32 %v631_v20, %v406_v21  ;;  %v662_v23 = vpop.f32.mrb[1].mxu0 }
 0x277   : > { %v409_v24 = vpop.f32.mrb[2].mxu0 }
 0x278   : > { %v412_v25 = vpack.c.bf16 %v407_v22, %v407_v22  ;;  %v663_v26 = vpop.f32.mrb[3].mxu0 }
 0x27a   : > { %427 = vrot.lane.b32.xlu0 %v412_v25, %s943_s11  ;;  %418 = vrot.lane.b32.xlu1 %v412_v25, %s944_s30  ;;  %414 = vst.msk [vmem:[%s1163_s19] sm:$0xf] %vm413_vm2, %v412_v25  ;;  %s1189_s11 = scalar_lea.hbm %s1286_s5, %s651_s14  ;;  %s453_s30 = scalar_lea.sflag [#allocation4], %s1138_s3 }
 0x27e   : > { %422 = vrot.lane.b32.xlu1 %v412_v25, %s945_s27  ;;  %s817_s27 = scalar_lea.vmem %s1180_s9, 256 }
 0x27f   : > { %p818_p13 = scmp.ne.s32.totalorder %s1180_s9, %s817_s27 }
 0x281   : > { %p819_p6 = pnand %p818_p13, %p1085_p10 }
 0x282   : > { %432 = vrot.lane.b32.xlu1 %v412_v25, %s946_s28  ;;  %s950_s28 = smov [#allocation7]  }
 0x283   : > { %p820_p8 = pneg %p819_p6 }
 0x286   : > { %437 = vrot.lane.b32.xlu1 %v412_v25, %s947_s17  ;;  %s821_s17 = sshll.u32 %s950_s28, 4  ;;  %s822_s17 = int_to_ptr.vmem [resolvable:$false] %s821_s17 }
 0x287   : > { %p824_p12 = scmp.lt.s32.totalorder %s1180_s9, %s822_s17 }
 0x28a   : > { %442 = vrot.lane.b32.xlu1 %v412_v25, %s948_s10  ;;  %s823_s10 = scalar_lea.vmem %s822_s17, 512 }
 0x28b   : > { %p825_p11 = scmp.lt.s32.totalorder %s823_s10, %s817_s27 }
 0x28d   : > { %p826_p0 = por %p825_p11, %p824_p12 }
 0x28e   : > { %447 = vrot.lane.b32.xlu1 %v412_v25, %s949_s29 }
 0x28f   : > { %p827_p5 = pnand %p826_p0, %p820_p8 }
 0x2ec   : > { %v428_v27 = vpop.permute.xlu0 %427  ;;  %v419_v28 = vpop.permute.xlu1 %418 }
 0x2ed   : > { %637 = vst.msk [vmem:[%s1167_s7 + $0x4] sm:$0xf] %vm413_vm2, %v428_v27  ;;  %421 = vst.msk [vmem:[%s1167_s7] sm:$0xf] %vm413_vm2, %v419_v28 }
 0x2f0   : > { %v423_v29 = vpop.permute.xlu1 %422 }
 0x2f1   : > { %636 = vst.msk [vmem:[%s1163_s19 + $0x4] sm:$0xf] %vm413_vm2, %v423_v29 }
 0x2f4   : > { %v433_v30 = vpop.permute.xlu1 %432 }
 0x2f5   : > { %638 = vst.msk [vmem:[%s1163_s19 + $0x8] sm:$0xf] %vm413_vm2, %v433_v30 }
 0x2f8   : > { %v438_v31 = vpop.permute.xlu1 %437 }
 0x2f9   : > { %639 = vst.msk [vmem:[%s1167_s7 + $0x8] sm:$0xf] %vm413_vm2, %v438_v31 }
 0x2fc   : > { %v443_v32 = vpop.permute.xlu1 %442 }
 0x2fd   : > { %640 = vst.msk [vmem:[%s1163_s19 + $0xc] sm:$0xf] %vm413_vm2, %v443_v32 }
 0x2fe   : > { %830 = shalt.err (!%p827_p5)
}
 0x2ff   : > { %s831_s19 = scalar_lea.hbm %s1189_s11, 256  ;;  %s835_s16 = scalar_lea.hbm %s1286_s5, 512 }
 0x300   : > { %p832_p9 = scmp.ne.s32.totalorder %s1189_s11, %s831_s19  ;;  %p836_p7 = scmp.lt.u32.totalorder %s1189_s11, %s1286_s5 }
 0x301   : > { %p837_p3 = scmp.lt.u32.totalorder %s835_s16, %s831_s19  ;;  %p839_p13 = scmp.lt.u32.totalorder %s831_s19, %s1189_s11 }
 0x302   : > { %p833_p1 = pnand %p832_p9, %p1085_p10 }
 0x303   : > { %p838_p4 = por %p837_p3, %p836_p7 }
 0x304   : > { %p834_p2 = pneg %p833_p1 }
 0x305   : > { %p840_p6 = por %p839_p13, %p838_p4 }
 0x307   : > { %p841_p8 = pnand %p840_p6, %p834_p2 }
 0x309   : > { %844 = shalt.err (!%p841_p8)
}
 0x30a   : > { %s951_s27 = smov 64   ;;  %s952_s10 = smov 4   ;;  %v448_v33 = vpop.permute.xlu1 %447 }
 0x30b   : > { %670 = dma.vmem_to_hbm [thread:$0]  (%p1085_p10), %s1180_s9, 256, %s1189_s11, %s453_s30, %s951_s27, %s951_s27, %s952_s10  }
 0x30c   : > { %s1227_s12 = scalar_lea.hbm %s1287_s6, %s651_s14  ;;  %641 = vst.msk [vmem:[%s1167_s7 + $0xc] sm:$0xf] %vm413_vm2, %v448_v33  ;;  %s458_s16 = scalar_lea.sflag [#allocation9], %s1138_s3 }
 0x30d   : > { %s845_s28 = scalar_lea.vmem %s1191_s15, 256  ;;  %s953_s17 = smov [#allocation8]  }
 0x30e   : > { %p846_p12 = scmp.ne.s32.totalorder %s1191_s15, %s845_s28  ;;  %s849_s0 = sshll.u32 %s953_s17, 4  ;;  %s850_s0 = int_to_ptr.vmem [resolvable:$false] %s849_s0 }
 0x30f   : > { %s851_s1 = scalar_lea.vmem %s850_s0, 512  ;;  %p852_p5 = scmp.lt.s32.totalorder %s1191_s15, %s850_s0 }
 0x310   : > { %p847_p11 = pnand %p846_p12, %p1085_p10  ;;  %p853_p9 = scmp.lt.s32.totalorder %s851_s1, %s845_s28 }
 0x312   : > { %p848_p0 = pneg %p847_p11  ;;  %p854_p1 = por %p853_p9, %p852_p5 }
 0x314   : > { %p855_p2 = pnand %p854_p1, %p848_p0 }
 0x316   : > { %858 = shalt.err (!%p855_p2)
}
 0x317   : > { %s859_s24 = scalar_lea.hbm %s1227_s12, 256  ;;  %s863_s14 = scalar_lea.hbm %s1287_s6, 512 }
 0x318   : > { %p860_p7 = scmp.ne.s32.totalorder %s1227_s12, %s859_s24  ;;  %p864_p13 = scmp.lt.u32.totalorder %s1227_s12, %s1287_s6 }
 0x319   : > { %p865_p6 = scmp.lt.u32.totalorder %s863_s14, %s859_s24  ;;  %p867_p12 = scmp.lt.u32.totalorder %s859_s24, %s1227_s12 }
 0x31a   : > { %p861_p3 = pnand %p860_p7, %p1085_p10 }
 0x31b   : > { %p866_p8 = por %p865_p6, %p864_p13 }
 0x31c   : > { %p862_p4 = pneg %p861_p3 }
 0x31d   : > { %p868_p11 = por %p867_p12, %p866_p8 }
 0x31f   : > { %p869_p0 = pnand %p868_p11, %p862_p4 }
 0x321   : > { %872 = shalt.err (!%p869_p0)
}
 0x322   : > { %671 = dma.vmem_to_hbm [thread:$0]  (%p1085_p10), %s1191_s15, 256, %s1227_s12, %s458_s16, %s951_s27, %s951_s27, %s952_s10  }
 0x323 PF: > { %s504_s1 = sand.u32 1, %s915_s21   ;;  %p1311_p5 = scmp.ne.s32.totalorder %s1298_s8, 0 }
 0x324   : > { %p1312_p9 = scmp.ge.s32.totalorder %s935_s26, 2  ;;  %s505_s30 = scalar_lea.sflag [#allocation4], %s504_s1 }
 0x326   : > { %p683_p1 = pnand %p1312_p9, %p1311_p5 }
 0x328   : > { %906 = dma.done.wait (!%p683_p1), %s505_s30, 256  }
 0x329   : > { %908 = vsyncadd (!%p683_p1), %s505_s30, 4294967040  ;;  %s514_s18 = scalar_lea.sflag [#allocation9], %s504_s1 }
 0x32a   : > { %910 = dma.done.wait (!%p683_p1), %s514_s18, 256  }
 0x32b   : > { %912 = vsyncadd (!%p683_p1), %s514_s18, 4294967040  ;;  %s27_s26 = sadd.s32 1, %s935_s26   ;;  %s1313_s21 = smov %s919_s22 }
 0x32c   : > { %p24_p2 = scmp.ge.s32.totalorder %s27_s26, 4   ;;  %s1314_s22 = smov %s923_s23 }
 0x32d   : > { %s1315_s23 = smov %s1094_s20  ;;  %s1316_s24 = smov %s931_s25 }
 0x32e   : > { %s1317_s25 = smov %s1319_s13  ;;  %26 = sbr.rel (!%p24_p2) target bundleno = 13 (0xd), region = 112 }
 0x335   :  { %519 = vsyncpa [#allocation3], 1 }
 0x336   :  { %521 = vsyncpa [#allocation3 + $0x1], 1 }
 0x337   :  { %522 = vsyncpa [#allocation6], 1 }
 0x338   :  { %523 = vsyncpa [#allocation4], 1 }
 0x339   :  { %525 = vsyncpa [#allocation4 + $0x1], 1 }
 0x33a   :  { %526 = vsyncpa [#allocation9], 1 }
 0x33b   :  { %528 = vsyncpa [#allocation9 + $0x1], 1 }

// kernel: tpu_custom_call.1
= control target key start
LH: loop header
LB: loop body
LE: loop exit
PB: predicated region body
PF: predicated region fallthrough
CT: control target
= control target key end

     0   :  { %s1281_s0 = inlined_call_operand.hbm [shape: f32[2,8,32], index: 0, kind: input, shape index: {}]   ;;  %s1282_s1 = inlined_call_operand.vmem [shape: f32[1,32], index: 1, kind: input, shape index: {}]   ;;  %s1283_s2 = inlined_call_operand.vmem [shape: f32[1,32], index: 2, kind: input, shape index: {}]   ;;  %s1284_s3 = inlined_call_operand.hbm [shape: bf16[32,64], index: 3, kind: input, shape index: {}]   ;;  %s1285_s4 = inlined_call_operand.vmem [shape: f32[1,64], index: 4, kind: input, shape index: {}]   ;;  %s1286_s5 = inlined_call_operand.hbm [shape: bf16[2,4,8,8], index: 5, kind: output, shape index: {0}]   ;;  %s1287_s6 = inlined_call_operand.hbm [shape: bf16[2,4,8,8], index: 6, kind: output, shape index: {1}]  }
   0x1   :  { %1292 = sst [smem:[#allocation14_spill]] %s1281_s0 }
   0x2   :  { %1293 = sst [smem:[#allocation15_spill]] %s1282_s1 }
   0x3   :  { %1294 = sst [smem:[#allocation16_spill]] %s1284_s3 }
   0x4   :  { %12 = vsyncpa [#allocation3], 0 }
   0x5   :  { %14 = vsyncpa [#allocation3 + $0x1], 0 }
   0x6   :  { %15 = vsyncpa [#allocation6], 0 }
   0x7   :  { %16 = vsyncpa [#allocation4], 0 }
   0x8   :  { %18 = vsyncpa [#allocation4 + $0x1], 0 }
   0x9   :  { %19 = vsyncpa [#allocation9], 0 }
   0xa   :  { %21 = vsyncpa [#allocation9 + $0x1], 0  ;;  %s989_s21 = smov 0   ;;  %s991_s22 = smov 0  }
   0xb   :  { %s993_s23 = smov 0   ;;  %s995_s24 = smov 0  }
   0xc   :  { %s997_s25 = smov 0   ;;  %s999_s26 = smov 0  }
   0xd LB: > { %s617_s27 = sadd.s32 4294967295, %s935_s26   ;;  %s618_s28 = sadd.s32 4294967294, %s935_s26   ;;  %s935_s26 = sphi %s999_s26, %s27_s26   ;;  %s931_s25 = sphi %s997_s25, %s1317_s25   ;;  %s927_s24 = sphi %s995_s24, %s1316_s24   ;;  %s923_s23 = sphi %s993_s23, %s1315_s23   ;;  %s919_s22 = sphi %s991_s22, %s1314_s22   ;;  %s915_s21 = sphi %s989_s21, %s1313_s21  }
   0xe   : > { %p61_p0 = scmp.ne.s32.totalorder %s919_s22, %s915_s21  ;;  %p1023_p1 = scmp.eq.s32.totalorder %s617_s27, 0 }
   0xf   : > { %p1027_p2 = scmp.eq.s32.totalorder %s617_s27, 1  ;;  %p177_p3 = scmp.eq.s32.totalorder %s618_s28, 1 }
  0x10   : > { %s1295_s29 = scalar_select %p1023_p1, 1, 0 }
  0x11   : > { %s1296_s30 = scalar_select %p1027_p2, 1, 0 }
  0x12   : > { %p1033_p4 = por %p1023_p1, %p61_p0  ;;  %p619_p5 = scmp.ge.s32.totalorder %s935_s26, 1 }
  0x13   : > { %p1038_p6 = por %p177_p3, %p61_p0  ;;  %p212_p7 = scmp.lt.s32.totalorder %s935_s26, 3 }
  0x14   : > { %s1297_s7 = scalar_select %p1033_p4, 1, 0 }
  0x15   : > { %s1298_s8 = scalar_select %p1038_p6, 1, 0 }
  0x16   : > { %p1043_p8 = pnand %p619_p5, %p212_p7  ;;  %s937_s10 = smov [#allocation5]  }
  0x17   : > { %s230_s11 = sshll.u32 %s937_s10, 4  ;;  %s39_s13 = sadd.s32 1, %s931_s25  ;;  %s231_s11 = int_to_ptr.vmem [resolvable:$true] %s230_s11 }
  0x18   : > { %s1299_s9 = scalar_select %p1043_p8, 1, 0 }
  0x19   : > { %p674_p9 = pneg %p1043_p8  ;;  %s1301_s3 = sld [smem:[#allocation16_spill]] }
  0x1b   : > { %p1052_p11 = pnand %p674_p9, %p1023_p1 }
  0x1d   : > { %p761_p13 = pneg %p1052_p11 }
  0x1f   : > { %s759_s16 = scalar_lea.hbm %s1301_s3, 256 }
  0x20   : > { %p760_p12 = scmp.ne.s32.totalorder %s1301_s3, %s759_s16  ;;  %p766_p5 = scmp.lt.u32.totalorder %s759_s16, %s1301_s3 }
  0x22   : > { %p762_p0 = pnand %p761_p13, %p760_p12 }
  0x24   : > { %p763_p3 = pneg %p762_p0 }
  0x26   : > { %p768_p7 = pnand %p766_p5, %p763_p3 }
  0x28   : > { %771 = shalt.err (!%p768_p7)
}
  0x29   : > { %s772_s27 = scalar_lea.vmem %s231_s11, 256  ;;  %p780_p1 = scmp.lt.s32.totalorder %s231_s11, %s231_s11 }
  0x2a   : > { %p773_p9 = scmp.ne.s32.totalorder %s231_s11, %s772_s27  ;;  %p781_p4 = scmp.lt.s32.totalorder %s772_s27, %s772_s27 }
  0x2c   : > { %p775_p10 = pnand %p773_p9, %p761_p13  ;;  %p782_p8 = por %p781_p4, %p780_p1 }
  0x2e   : > { %p776_p6 = pneg %p775_p10 }
  0x30   : > { %p783_p2 = pnand %p782_p8, %p776_p6 }
  0x32   : > { %786 = shalt.err (!%p783_p2)
}
  0x33   : > { %s938_s28 = smov 64   ;;  %s939_s10 = smov 4  }
  0x34   : > { %677 = dma.hbm_to_vmem [thread:$0]  (!%p1052_p11), %s1301_s3, 256, %s231_s11, [#allocation6], %s938_s28, %s938_s28, %s939_s10  }
  0x35   : > { %p41_p1 = scmp.ge.s32.totalorder %s39_s13, 2  ;;  %s48_s16 = sadd.s32 1, %s923_s23 }
  0x36   : > { %p55_p2 = scmp.ne.s32.totalorder %s923_s23, %s919_s22  ;;  %p56_p4 = scmp.eq.s32.totalorder %s935_s26, 0 }
  0x37   : > { %s1319_s13 = smov (%p41_p1, %s39_s13), 0  ;;  %p1303_p8 = scmp.ne.s32.totalorder %s1296_s30, 0 }
  0x38   : > { %p1079_p6 = por %p56_p4, %p55_p2  ;;  %s43_s12 = ssub.s32 %s931_s25, %s1319_s13 }
  0x39   : > { %p1085_p10 = por %p1303_p8, %p55_p2  ;;  %p690_p12 = scmp.lt.s32.totalorder %s935_s26, 2 }
  0x3a   : > { %p46_p11 = scmp.eq.s32.totalorder %s43_s12, 0  ;;  %s247_s11 = sand.u32 1, %s923_s23  }
  0x3b   : > { %s622_s19 = sshll.u32 %s247_s11, 3  ;;  %s623_s27 = sshll.u32 %s931_s25, 7 }
  0x3c   : > { %s1094_s20 = scalar_select %p46_p11, %s923_s23, %s48_s16  }
  0x3d   : > { %s1305_s0 = sld [smem:[#allocation14_spill]]  ;;  %s251_s30 = scalar_lea.vmem [#allocation2], %s622_s19 }
  0x3e   : > { %s259_s15 = sshll.u32 %s251_s30, 4  ;;  %p1106_p13 = pnand %p690_p12, %p1079_p6  ;;  %s1102_s15 = int_to_ptr.vmem [resolvable:$true] %s259_s15 }
  0x3f   : > { %s248_s16 = scalar_lea.sflag [#allocation3], %s247_s11 }
  0x40   : > { %p789_p3 = pneg %p1106_p13 }
  0x43   : > { %s1100_s14 = scalar_lea.hbm %s1305_s0, %s623_s27  ;;  %s792_s28 = scalar_lea.hbm %s1305_s0, 256 }
  0x44   : > { %s787_s3 = scalar_lea.hbm %s1100_s14, 128  ;;  %p793_p9 = scmp.lt.u32.totalorder %s1100_s14, %s1305_s0 }
  0x45   : > { %p788_p0 = scmp.ne.s32.totalorder %s1100_s14, %s787_s3  ;;  %p794_p1 = scmp.lt.u32.totalorder %s792_s28, %s787_s3 }
  0x46   : > { %p796_p4 = scmp.lt.u32.totalorder %s787_s3, %s1100_s14 }
  0x47   : > { %p790_p5 = pnand %p789_p3, %p788_p0  ;;  %p795_p2 = por %p794_p1, %p793_p9 }
  0x49   : > { %p791_p7 = pneg %p790_p5  ;;  %p797_p6 = por %p796_p4, %p795_p2 }
  0x4b   : > { %p798_p8 = pnand %p797_p6, %p791_p7 }
  0x4d   : > { %801 = shalt.err (!%p798_p8)
}
  0x4e   : > { %s802_s11 = scalar_lea.vmem %s1102_s15, 128  ;;  %s940_s30 = smov [#allocation2]  }
  0x4f   : > { %p803_p12 = scmp.ne.s32.totalorder %s1102_s15, %s802_s11  ;;  %s807_s19 = sshll.u32 %s940_s30, 4  ;;  %s808_s19 = int_to_ptr.vmem [resolvable:$false] %s807_s19 }
  0x50   : > { %s809_s27 = scalar_lea.vmem %s808_s19, 256  ;;  %p810_p5 = scmp.lt.s32.totalorder %s1102_s15, %s808_s19 }
  0x51   : > { %p805_p11 = pnand %p803_p12, %p789_p3  ;;  %p811_p9 = scmp.lt.s32.totalorder %s809_s27, %s802_s11 }
  0x53   : > { %p806_p0 = pneg %p805_p11  ;;  %p812_p1 = por %p811_p9, %p810_p5 }
  0x55   : > { %p813_p2 = pnand %p812_p1, %p806_p0 }
  0x57   : > { %816 = shalt.err (!%p813_p2)
}
  0x58   : > { %681 = dma.hbm_to_vmem [thread:$0]  (!%p1106_p13), %s1100_s14, 128, %s1102_s15, %s248_s16  }
  0x59   : > { %p1307_p7 = scmp.ne.s32.totalorder %s1299_s9, 0 }
  0x5a   : > { %s1138_s3 = sand.u32 (!%p1307_p7), 1, %s919_s22   ;;  %p1308_p3 = scmp.ne.s32.totalorder (!%p1307_p7), %s1297_s7, 0 }
  0x5b   : > { %268 = sbr.rel (%p1307_p7) target bundleno = 803 (0x323), region = 40  ;;  %s625_s28 = sshll.u32 (!%p1307_p7), %s1138_s3, 3 }
  0x5c   : > { %s271_s17 = scalar_lea.sflag (!%p1307_p7), [#allocation3], %s1138_s3  ;;  %s274_s10 = scalar_lea.vmem (!%p1307_p7), [#allocation2], %s625_s28 }
  0x62   : > { %898 = dma.done.wait (%p1308_p3), %s271_s17, 128  }
  0x63   : > { %900 = vsyncadd (%p1308_p3), %s271_s17, 4294967168  ;;  %p1309_p4 = scmp.ne.s32.totalorder %s1295_s29, 0 }
  0x65   : > { %902 = dma.done.wait (%p1309_p4), [#allocation6], 256  }
  0x66   : > { %904 = vsyncadd (%p1309_p4), [#allocation6], 4294967040  ;;  %vm316_vm0 = vcmask 261120   ;;  %v313_v0 = vld [vmem:[%s274_s10] sm:$0xff]  ;;  %v755_v7 = vld [vmem:[#allocation5] sm:$0xff]   ;;  %v941_v8 = vmov 0.0  }
  0x67   : > { %v317_v1 = vsel %vm316_vm0, %v313_v0, 0.0  ;;  %656 = vmatprep.subr.bf16.mxu0 %v941_v8  ;;  %vm942_vm1 = vmmov 0   ;;  %v756_v9 = vld [vmem:[#allocation5 + $0x8] sm:$0xff]   ;;  %s1310_s1 = sld [smem:[#allocation15_spill]]  ;;  %v630_v16 = vld [vmem:[%s1283_s2] ss:$0 sm:$0xff] }
  0x68   : > { %318 = vadd.xlane.f32.xlu0 %v317_v1  ;;  %660 = vmatprep.mubr.msk.bf16.mxu0 %vm942_vm1, %v941_v8  ;;  %v631_v20 = vld [vmem:[%s1285_s4] ss:$0 sm:$0xff]  ;;  %s627_s16 = sshll.u32 %s1138_s3, 4  ;;  %vm413_vm2 = vcmask 60416   ;;  %s943_s11 = smov 88  }
  0x69   : > { %657 = vmatpush3.bf16.msra.mxu0 %v755_v7  ;;  %s944_s30 = smov 96   ;;  %s1163_s19 = scalar_lea.vmem [#allocation7], %s627_s16 }
  0x6a   : > { %658 = vmatprep.subr.bf16.mxu0 %v941_v8  ;;  %s945_s27 = smov 120   ;;  %s946_s28 = smov 112  }
  0x6b   : > { %s947_s17 = smov 80   ;;  %s948_s10 = smov 104  }
  0x6c   : > { %s949_s29 = smov 72   ;;  %s1167_s7 = scalar_lea.vmem [#allocation8], %s627_s16 }
  0x6d   : > { %659 = vmatpush3.bf16.msra.mxu0 %v756_v9  ;;  %v629_v14 = vld [vmem:[%s1310_s1] ss:$0 sm:$0xff]  ;;  %s472_s9 = sshll.u32 %s1163_s19, 4  ;;  %s651_s14 = sshll.u32 %s927_s24, 8  ;;  %s1180_s9 = int_to_ptr.vmem [resolvable:$true] %s472_s9 }
  0x6e   : > { %s489_s15 = sshll.u32 %s1167_s7, 4  ;;  %s1191_s15 = int_to_ptr.vmem [resolvable:$true] %s489_s15 }
  0xf5   : > { %v319_v2 = vpop.xlane.xlu0 %318 }
  0xf6   : > { %v321_v3 = vmul.f32 0.03125, %v319_v2 }
  0xf8   : > { %v322_v4 = vsub.f32 %v313_v0, %v321_v3 }
  0xfa   : > { %v323_v5 = vmul.f32 %v322_v4, %v322_v4 }
  0xfc   : > { %v324_v6 = vsel %vm316_vm0, %v323_v5, 0.0 }
  0xfd   : > { %325 = vadd.xlane.f32.xlu0 %v324_v6 }
 0x18a   : > { %v326_v10 = vpop.xlane.xlu0 %325 }
 0x18b   : > { %v327_v11 = vmul.f32 0.03125, %v326_v10 }
 0x18d   : > { %v328_v12 = vadd.f32 1e-05, %v327_v11 }
 0x18f   : > { %757 = vrsqrt.f32 %v328_v12 }
 0x199   : > { %v758_v13 = vpop.eup %757 }
 0x19a   : > { %v330_v15 = vmul.f32 %v758_v13, %v322_v4 }
 0x19c   : > { %v337_v17 = vmul.f32 %v629_v14, %v330_v15 }
 0x19e   : > { %v344_v18 = vadd.f32 %v630_v16, %v337_v17 }
 0x1a0   : > { %v345_v19 = vpack.c.bf16 %v344_v18, %v344_v18 }
 0x1a2   : > { %661 = vmatmul.mubr.msk.bf16.vlgmr.msra.gmra.mrb[0].mxu0 %vm316_vm0, %v345_v19 }
 0x275   : > { %v406_v21 = vpop.f32.mrb[0].mxu0 }
 0x276   : > { %v407_v22 = vadd.f32 %v631_v20, %v406_v21  ;;  %v662_v23 = vpop.f32.mrb[1].mxu0 }
 0x277   : > { %v409_v24 = vpop.f32.mrb[2].mxu0 }
 0x278   : > { %v412_v25 = vpack.c.bf16 %v407_v22, %v407_v22  ;;  %v663_v26 = vpop.f32.mrb[3].mxu0 }
 0x27a   : > { %427 = vrot.lane.b32.xlu0 %v412_v25, %s943_s11  ;;  %418 = vrot.lane.b32.xlu1 %v412_v25, %s944_s30  ;;  %414 = vst.msk [vmem:[%s1163_s19] sm:$0xf] %vm413_vm2, %v412_v25  ;;  %s1189_s11 = scalar_lea.hbm %s1286_s5, %s651_s14  ;;  %s453_s30 = scalar_lea.sflag [#allocation4], %s1138_s3 }
 0x27e   : > { %422 = vrot.lane.b32.xlu1 %v412_v25, %s945_s27  ;;  %s817_s27 = scalar_lea.vmem %s1180_s9, 256 }
 0x27f   : > { %p818_p13 = scmp.ne.s32.totalorder %s1180_s9, %s817_s27 }
 0x281   : > { %p819_p6 = pnand %p818_p13, %p1085_p10 }
 0x282   : > { %432 = vrot.lane.b32.xlu1 %v412_v25, %s946_s28  ;;  %s950_s28 = smov [#allocation7]  }
 0x283   : > { %p820_p8 = pneg %p819_p6 }
 0x286   : > { %437 = vrot.lane.b32.xlu1 %v412_v25, %s947_s17  ;;  %s821_s17 = sshll.u32 %s950_s28, 4  ;;  %s822_s17 = int_to_ptr.vmem [resolvable:$false] %s821_s17 }
 0x287   : > { %p824_p12 = scmp.lt.s32.totalorder %s1180_s9, %s822_s17 }
 0x28a   : > { %442 = vrot.lane.b32.xlu1 %v412_v25, %s948_s10  ;;  %s823_s10 = scalar_lea.vmem %s822_s17, 512 }
 0x28b   : > { %p825_p11 = scmp.lt.s32.totalorder %s823_s10, %s817_s27 }
 0x28d   : > { %p826_p0 = por %p825_p11, %p824_p12 }
 0x28e   : > { %447 = vrot.lane.b32.xlu1 %v412_v25, %s949_s29 }
 0x28f   : > { %p827_p5 = pnand %p826_p0, %p820_p8 }
 0x2ec   : > { %v428_v27 = vpop.permute.xlu0 %427  ;;  %v419_v28 = vpop.permute.xlu1 %418 }
 0x2ed   : > { %637 = vst.msk [vmem:[%s1167_s7 + $0x4] sm:$0xf] %vm413_vm2, %v428_v27  ;;  %421 = vst.msk [vmem:[%s1167_s7] sm:$0xf] %vm413_vm2, %v419_v28 }
 0x2f0   : > { %v423_v29 = vpop.permute.xlu1 %422 }
 0x2f1   : > { %636 = vst.msk [vmem:[%s1163_s19 + $0x4] sm:$0xf] %vm413_vm2, %v423_v29 }
 0x2f4   : > { %v433_v30 = vpop.permute.xlu1 %432 }
 0x2f5   : > { %638 = vst.msk [vmem:[%s1163_s19 + $0x8] sm:$0xf] %vm413_vm2, %v433_v30 }
 0x2f8   : > { %v438_v31 = vpop.permute.xlu1 %437 }
 0x2f9   : > { %639 = vst.msk [vmem:[%s1167_s7 + $0x8] sm:$0xf] %vm413_vm2, %v438_v31 }
 0x2fc   : > { %v443_v32 = vpop.permute.xlu1 %442 }
 0x2fd   : > { %640 = vst.msk [vmem:[%s1163_s19 + $0xc] sm:$0xf] %vm413_vm2, %v443_v32 }
 0x2fe   : > { %830 = shalt.err (!%p827_p5)
}
 0x2ff   : > { %s831_s19 = scalar_lea.hbm %s1189_s11, 256  ;;  %s835_s16 = scalar_lea.hbm %s1286_s5, 512 }
 0x300   : > { %p832_p9 = scmp.ne.s32.totalorder %s1189_s11, %s831_s19  ;;  %p836_p7 = scmp.lt.u32.totalorder %s1189_s11, %s1286_s5 }
 0x301   : > { %p837_p3 = scmp.lt.u32.totalorder %s835_s16, %s831_s19  ;;  %p839_p13 = scmp.lt.u32.totalorder %s831_s19, %s1189_s11 }
 0x302   : > { %p833_p1 = pnand %p832_p9, %p1085_p10 }
 0x303   : > { %p838_p4 = por %p837_p3, %p836_p7 }
 0x304   : > { %p834_p2 = pneg %p833_p1 }
 0x305   : > { %p840_p6 = por %p839_p13, %p838_p4 }
 0x307   : > { %p841_p8 = pnand %p840_p6, %p834_p2 }
 0x309   : > { %844 = shalt.err (!%p841_p8)
}
 0x30a   : > { %s951_s27 = smov 64   ;;  %s952_s10 = smov 4   ;;  %v448_v33 = vpop.permute.xlu1 %447 }
 0x30b   : > { %670 = dma.vmem_to_hbm [thread:$0]  (%p1085_p10), %s1180_s9, 256, %s1189_s11, %s453_s30, %s951_s27, %s951_s27, %s952_s10  }
 0x30c   : > { %s1227_s12 = scalar_lea.hbm %s1287_s6, %s651_s14  ;;  %641 = vst.msk [vmem:[%s1167_s7 + $0xc] sm:$0xf] %vm413_vm2, %v448_v33  ;;  %s458_s16 = scalar_lea.sflag [#allocation9], %s1138_s3 }
 0x30d   : > { %s845_s28 = scalar_lea.vmem %s1191_s15, 256  ;;  %s953_s17 = smov [#allocation8]  }
 0x30e   : > { %p846_p12 = scmp.ne.s32.totalorder %s1191_s15, %s845_s28  ;;  %s849_s0 = sshll.u32 %s953_s17, 4  ;;  %s850_s0 = int_to_ptr.vmem [resolvable:$false] %s849_s0 }
 0x30f   : > { %s851_s1 = scalar_lea.vmem %s850_s0, 512  ;;  %p852_p5 = scmp.lt.s32.totalorder %s1191_s15, %s850_s0 }
 0x310   : > { %p847_p11 = pnand %p846_p12, %p1085_p10  ;;  %p853_p9 = scmp.lt.s32.totalorder %s851_s1, %s845_s28 }
 0x312   : > { %p848_p0 = pneg %p847_p11  ;;  %p854_p1 = por %p853_p9, %p852_p5 }
 0x314   : > { %p855_p2 = pnand %p854_p1, %p848_p0 }
 0x316   : > { %858 = shalt.err (!%p855_p2)
}
 0x317   : > { %s859_s24 = scalar_lea.hbm %s1227_s12, 256  ;;  %s863_s14 = scalar_lea.hbm %s1287_s6, 512 }
 0x318   : > { %p860_p7 = scmp.ne.s32.totalorder %s1227_s12, %s859_s24  ;;  %p864_p13 = scmp.lt.u32.totalorder %s1227_s12, %s1287_s6 }
 0x319   : > { %p865_p6 = scmp.lt.u32.totalorder %s863_s14, %s859_s24  ;;  %p867_p12 = scmp.lt.u32.totalorder %s859_s24, %s1227_s12 }
 0x31a   : > { %p861_p3 = pnand %p860_p7, %p1085_p10 }
 0x31b   : > { %p866_p8 = por %p865_p6, %p864_p13 }
 0x31c   : > { %p862_p4 = pneg %p861_p3 }
 0x31d   : > { %p868_p11 = por %p867_p12, %p866_p8 }
 0x31f   : > { %p869_p0 = pnand %p868_p11, %p862_p4 }
 0x321   : > { %872 = shalt.err (!%p869_p0)
}
 0x322   : > { %671 = dma.vmem_to_hbm [thread:$0]  (%p1085_p10), %s1191_s15, 256, %s1227_s12, %s458_s16, %s951_s27, %s951_s27, %s952_s10  }
 0x323 PF: > { %s504_s1 = sand.u32 1, %s915_s21   ;;  %p1311_p5 = scmp.ne.s32.totalorder %s1298_s8, 0 }
 0x324   : > { %p1312_p9 = scmp.ge.s32.totalorder %s935_s26, 2  ;;  %s505_s30 = scalar_lea.sflag [#allocation4], %s504_s1 }
 0x326   : > { %p683_p1 = pnand %p1312_p9, %p1311_p5 }
 0x328   : > { %906 = dma.done.wait (!%p683_p1), %s505_s30, 256  }
 0x329   : > { %908 = vsyncadd (!%p683_p1), %s505_s30, 4294967040  ;;  %s514_s18 = scalar_lea.sflag [#allocation9], %s504_s1 }
 0x32a   : > { %910 = dma.done.wait (!%p683_p1), %s514_s18, 256  }
 0x32b   : > { %912 = vsyncadd (!%p683_p1), %s514_s18, 4294967040  ;;  %s27_s26 = sadd.s32 1, %s935_s26   ;;  %s1313_s21 = smov %s919_s22 }
 0x32c   : > { %p24_p2 = scmp.ge.s32.totalorder %s27_s26, 4   ;;  %s1314_s22 = smov %s923_s23 }
 0x32d   : > { %s1315_s23 = smov %s1094_s20  ;;  %s1316_s24 = smov %s931_s25 }
 0x32e   : > { %s1317_s25 = smov %s1319_s13  ;;  %26 = sbr.rel (!%p24_p2) target bundleno = 13 (0xd), region = 112 }
 0x335   :  { %519 = vsyncpa [#allocation3], 1 }
 0x336   :  { %521 = vsyncpa [#allocation3 + $0x1], 1 }
 0x337   :  { %522 = vsyncpa [#allocation6], 1 }
 0x338   :  { %523 = vsyncpa [#allocation4], 1 }
 0x339   :  { %525 = vsyncpa [#allocation4 + $0x1], 1 }
 0x33a   :  { %526 = vsyncpa [#allocation9], 1 }
 0x33b   :  { %528 = vsyncpa [#allocation9 + $0x1], 1 }

</bundles_post_ra>
